<compile_context>
chip_gen: v6e
topology: v6e:2x2x1
jax: 0.10.0
libtpu: 0.0.40
codegen_flags: <defaults>
</compile_context>

<pallas_src>
import math
import functools

import jax
import jax.numpy as jnp
from jax.experimental import pallas as pl
from jax.experimental.pallas import tpu as pltpu


# ----------------------------- math helpers ---------------------------------

def _gelu_tanh(x):
    # matches torch.nn.GELU(approximate='tanh')
    c = math.sqrt(2.0 / math.pi)
    return 0.5 * x * (1.0 + jnp.tanh(c * (x + 0.044715 * x * x * x)))


def _layernorm(x, g, b, eps=1e-5):
    # matches torch.nn.LayerNorm (biased variance, eps inside rsqrt)
    mu = jnp.mean(x, axis=-1, keepdims=True)
    var = jnp.mean((x - mu) ** 2, axis=-1, keepdims=True)
    return (x - mu) * jax.lax.rsqrt(var + eps) * g + b


# ------------------------------ Pallas kernel -------------------------------

def block_kernel(x_full_ref, x_tile_ref,
                 ln1_g_ref, ln1_b_ref,
                 w_attn_ref, b_attn_ref,
                 w_proj_ref, b_proj_ref,
                 ln2_g_ref, ln2_b_ref,
                 w_fc_ref, b_fc_ref,
                 w_fc_proj_ref, b_fc_proj_ref,
                 o_ref,
                 q_sc, k_sc, v_sc, y_sc,
                 *, n_head):
    qt = pl.program_id(1)
    T = x_full_ref.shape[1]
    TQ = x_tile_ref.shape[1]
    C = x_full_ref.shape[2]
    H = n_head
    D = C // H
    bf16 = jnp.bfloat16

    # ------- full-sequence QKV projection: once per batch element -----------
    # Done at the first query tile; Q/K/V live head-major in persistent VMEM
    # scratch and are reused by every subsequent query tile of this batch elem.
    @pl.when(qt == 0)
    def _():
        xf = x_full_ref[0]                                       # (T, C) f32
        h1 = _layernorm(xf, ln1_g_ref[0], ln1_b_ref[0])
        qkv = jnp.dot(h1.astype(bf16), w_attn_ref[...],
                      preferred_element_type=jnp.float32) + b_attn_ref[0]
        qq = qkv[:, :C] * (1.0 / math.sqrt(D))   # fold softmax scale into q
        kk = qkv[:, C:2 * C]
        vv = qkv[:, 2 * C:]
        for h in range(H):       # static unroll: layout shuffle only, no matmuls
            q_sc[h] = qq[:, h * D:(h + 1) * D].astype(bf16)
            k_sc[h] = kk[:, h * D:(h + 1) * D].astype(bf16)
            v_sc[h] = vv[:, h * D:(h + 1) * D].astype(bf16)

    # ---------------- per-query-tile attention ----------------
    q0 = pl.multiple_of(qt * TQ, TQ)
    q_t = q_sc[:, pl.ds(q0, TQ), :]                              # (H, TQ, D) bf16

    # batched-over-heads attention matmuls, bf16 operands / f32 accumulation
    att = jnp.einsum('htd,hsd->hts', q_t, k_sc[...],
                     preferred_element_type=jnp.float32)         # (H, TQ, T)

    row = qt * TQ + jax.lax.broadcasted_iota(jnp.int32, (TQ, T), 0)
    col = jax.lax.broadcasted_iota(jnp.int32, (TQ, T), 1)
    att = jnp.where((col <= row)[None, :, :], att, -jnp.inf)

    att = att - jnp.max(att, axis=-1, keepdims=True)
    p = jnp.exp(att)
    p = p * pl.reciprocal(jnp.sum(p, axis=-1, keepdims=True), approx=True)

    y = jnp.einsum('hts,hsd->htd', p.astype(bf16), v_sc[...],
                   preferred_element_type=jnp.float32)           # (H, TQ, D)
    for h in range(H):                # merge heads into a (TQ, C) bf16 VMEM slab
        y_sc[:, h * D:(h + 1) * D] = y[h].astype(bf16)

    x_t = x_tile_ref[0]                                          # (TQ, C) f32
    attn_out = jnp.dot(y_sc[...], w_proj_ref[...],
                       preferred_element_type=jnp.float32) + b_proj_ref[0]
    x1 = x_t + attn_out                      # residual 1

    # ---------------- MLP branch ----------------
    h2 = _layernorm(x1, ln2_g_ref[0], ln2_b_ref[0])
    f = jnp.dot(h2.astype(bf16), w_fc_ref[...],
                preferred_element_type=jnp.float32) + b_fc_ref[0]
    f = _gelu_tanh(f)
    mlp = jnp.dot(f.astype(bf16), w_fc_proj_ref[...],
                  preferred_element_type=jnp.float32) + b_fc_proj_ref[0]

    o_ref[0] = (x1 + mlp).astype(o_ref.dtype)   # residual 2


# ------------------------------ wrapper --------------------------------------

def gpt2_block(x, params, n_head, *, q_tile=None):
    B, T, C = x.shape
    H = n_head
    D = C // H

    if q_tile is None:
        # prefer 256-aligned query tiles (fills v6e/v7x 256-wide MXU), then 128,
        # otherwise fall back to the whole sequence (tiny / toy configs).
        for cand in (256, 128):
            if T % cand == 0:
                q_tile = cand
                break
        else:
            q_tile = T
    assert T % q_tile == 0
    nq = T // q_tile

    (ln1g, ln1b, wa, ba, wp, bp, ln2g, ln2b, wf, bfc, wfp, bfp) = params
    # Weights stored/DMA'd as bf16 (halves HBM traffic and VMEM footprint);
    # accumulation stays f32 inside the kernel.
    wa_b, wp_b, wf_b, wfp_b = (w.astype(jnp.bfloat16) for w in (wa, wp, wf, wfp))

    def const_spec(shape):
        # full-array block, constant index -> DMA'd once, never re-fetched
        return pl.BlockSpec(shape, lambda b, qt: (0,) * len(shape))

    in_specs = [
        pl.BlockSpec((1, T, C), lambda b, qt: (b, 0, 0)),        # x: full slab (QKV pass)
        pl.BlockSpec((1, q_tile, C), lambda b, qt: (b, qt, 0)),  # x: query tile (residual)
        const_spec((1, C)), const_spec((1, C)),                  # ln_1 gamma / beta
        const_spec((C, 3 * C)), const_spec((1, 3 * C)),          # c_attn W / b
        const_spec((C, C)), const_spec((1, C)),                  # attn c_proj W / b
        const_spec((1, C)), const_spec((1, C)),                  # ln_2 gamma / beta
        const_spec((C, 4 * C)), const_spec((1, 4 * C)),          # mlp c_fc W / b
        const_spec((4 * C, C)), const_spec((1, C)),              # mlp c_proj W / b
    ]

    # Advisory cost estimate for XLA scheduling around the custom call.
    flops = 2 * B * T * 12 * C * C + 4 * B * T * T * C
    transcendentals = B * T * 4 * C + B * H * T * T
    bytes_accessed = 3 * B * T * C * 4 + 12 * C * C * 2 + 14 * C * 4

    return pl.pallas_call(
        functools.partial(block_kernel, n_head=n_head),
        out_shape=jax.ShapeDtypeStruct((B, T, C), x.dtype),
        grid_spec=pltpu.PrefetchScalarGridSpec(
            num_scalar_prefetch=0,
            grid=(B, nq),
            in_specs=in_specs,
            out_specs=pl.BlockSpec((1, q_tile, C), lambda b, qt: (b, qt, 0)),
            scratch_shapes=[
                pltpu.VMEM((H, T, D), jnp.bfloat16),    # Q head-major (per batch elem)
                pltpu.VMEM((H, T, D), jnp.bfloat16),    # K head-major (per batch elem)
                pltpu.VMEM((H, T, D), jnp.bfloat16),    # V head-major (per batch elem)
                pltpu.VMEM((q_tile, C), jnp.bfloat16),  # merged attention output (per tile)
            ],
        ),
        compiler_params=pltpu.CompilerParams(
            dimension_semantics=("parallel", "arbitrary"),
            vmem_limit_bytes=64 * 1024 * 1024,          # <= physical VMEM on all gens
        ),
        cost_estimate=pl.CostEstimate(flops=flops,
                                      transcendentals=transcendentals,
                                      bytes_accessed=bytes_accessed),
    )(x, x, ln1g, ln1b, wa_b, ba, wp_b, bp, ln2g, ln2b, wf_b, bfc, wfp_b, bfp)


# ------------------------- pure-JAX reference --------------------------------

def ref_block(x, params, n_head):
    (ln1g, ln1b, wa, ba, wp, bp, ln2g, ln2b, wf, bfc, wfp, bfp) = params
    B, T, C = x.shape
    D = C // n_head
    h1 = _layernorm(x, ln1g[0], ln1b[0])
    qkv = h1 @ wa + ba[0]
    q, k, v = jnp.split(qkv, 3, axis=-1)
    q = q.reshape(B, T, n_head, D).transpose(0, 2, 1, 3)
    k = k.reshape(B, T, n_head, D).transpose(0, 2, 1, 3)
    v = v.reshape(B, T, n_head, D).transpose(0, 2, 1, 3)
    att = jnp.einsum('bhtd,bhsd->bhts', q, k) / math.sqrt(D)
    mask = jnp.tril(jnp.ones((T, T), bool))
    att = jnp.where(mask, att, -jnp.inf)
    att = jax.nn.softmax(att, axis=-1)
    y = jnp.einsum('bhts,bhsd->bhtd', att, v).transpose(0, 2, 1, 3).reshape(B, T, C)
    x1 = x + (y @ wp + bp[0])
    h2 = _layernorm(x1, ln2g[0], ln2b[0])
    f = _gelu_tanh(h2 @ wf + bfc[0])
    return x1 + (f @ wfp + bfp[0])


# ------------------------------ main ------------------------------------------

if __name__ == "__main__":
    B, T, C, H = 2, 16, 32, 4   # batch, seq, n_embd, n_head  (block_size == T)
    key = jax.random.PRNGKey(0)
    ks = jax.random.split(key, 10)

    def w(k, shape):
        return (0.02 * jax.random.normal(k, shape)).astype(jnp.float32)

    params = (
        jnp.ones((1, C), jnp.float32),        # ln_1.weight
        jnp.zeros((1, C), jnp.float32),       # ln_1.bias
        w(ks[0], (C, 3 * C)),                 # attn.c_attn.weight (in, out)
        w(ks[5], (1, 3 * C)),                 # attn.c_attn.bias
        w(ks[1], (C, C)),                     # attn.c_proj.weight
        w(ks[6], (1, C)),                     # attn.c_proj.bias
        jnp.ones((1, C), jnp.float32),        # ln_2.weight
        jnp.zeros((1, C), jnp.float32),       # ln_2.bias
        w(ks[2], (C, 4 * C)),                 # mlp.c_fc.weight
        w(ks[7], (1, 4 * C)),                 # mlp.c_fc.bias
        w(ks[3], (4 * C, C)),                 # mlp.c_proj.weight
        w(ks[8], (1, C)),                     # mlp.c_proj.bias
    )

    x = jax.random.normal(ks[4], (B, T, C), jnp.float32)

    # q_tile=8 exercises the multi-query-tile path (2 tiles per batch element).
    out = jax.block_until_ready(gpt2_block(x, params, H, q_tile=8))
    ref = ref_block(x, params, H)

    assert out.shape == (B, T, C)
    err = float(jnp.max(jnp.abs(out - ref)))
    # bf16 matmul operands + approx reciprocal -> loosened tolerance vs f32 ref
    assert err < 2e-2, err
    print("KERNEL_OK")
</pallas_src>

<mosaic_0001>
module attributes {stable_mosaic.version = 11 : i64} {
  func.func @block_kernel(%arg0: i32, %arg1: i32, %arg2: memref<1x16x32xf32, #tpu.memory_space<vmem>>, %arg3: memref<1x8x32xf32, #tpu.memory_space<vmem>>, %arg4: memref<1x32xf32, #tpu.memory_space<vmem>>, %arg5: memref<1x32xf32, #tpu.memory_space<vmem>>, %arg6: memref<32x96xbf16, #tpu.memory_space<vmem>>, %arg7: memref<1x96xf32, #tpu.memory_space<vmem>>, %arg8: memref<32x32xbf16, #tpu.memory_space<vmem>>, %arg9: memref<1x32xf32, #tpu.memory_space<vmem>>, %arg10: memref<1x32xf32, #tpu.memory_space<vmem>>, %arg11: memref<1x32xf32, #tpu.memory_space<vmem>>, %arg12: memref<32x128xbf16, #tpu.memory_space<vmem>>, %arg13: memref<1x128xf32, #tpu.memory_space<vmem>>, %arg14: memref<128x32xbf16, #tpu.memory_space<vmem>>, %arg15: memref<1x32xf32, #tpu.memory_space<vmem>>, %arg16: memref<1x8x32xf32, #tpu.memory_space<vmem>>, %arg17: memref<4x16x8xbf16, #tpu.memory_space<vmem>>, %arg18: memref<4x16x8xbf16, #tpu.memory_space<vmem>>, %arg19: memref<4x16x8xbf16, #tpu.memory_space<vmem>>, %arg20: memref<8x32xbf16, #tpu.memory_space<vmem>>) attributes {dimension_semantics = [#tpu.dimension_semantics<parallel>, #tpu.dimension_semantics<arbitrary>], iteration_bounds = array<i64: 2, 2>, scalar_prefetch = 0 : i64, scratch_operands = 4 : i64, tpu.core_type = #tpu.core_type<tc>, window_params = [{transform_indices = @transform_0, window_bounds = array<i64: 1, 16, 32>}, {transform_indices = @transform_1, window_bounds = array<i64: 1, 8, 32>}, {pipeline_mode = #tpu.pipeline_mode<synchronous>, transform_indices = @transform_2, window_bounds = array<i64: 1, 32>}, {pipeline_mode = #tpu.pipeline_mode<synchronous>, transform_indices = @transform_3, window_bounds = array<i64: 1, 32>}, {pipeline_mode = #tpu.pipeline_mode<synchronous>, transform_indices = @transform_4, window_bounds = array<i64: 32, 96>}, {pipeline_mode = #tpu.pipeline_mode<synchronous>, transform_indices = @transform_5, window_bounds = array<i64: 1, 96>}, {pipeline_mode = #tpu.pipeline_mode<synchronous>, transform_indices = @transform_6, window_bounds = array<i64: 32, 32>}, {pipeline_mode = #tpu.pipeline_mode<synchronous>, transform_indices = @transform_7, window_bounds = array<i64: 1, 32>}, {pipeline_mode = #tpu.pipeline_mode<synchronous>, transform_indices = @transform_8, window_bounds = array<i64: 1, 32>}, {pipeline_mode = #tpu.pipeline_mode<synchronous>, transform_indices = @transform_9, window_bounds = array<i64: 1, 32>}, {pipeline_mode = #tpu.pipeline_mode<synchronous>, transform_indices = @transform_10, window_bounds = array<i64: 32, 128>}, {pipeline_mode = #tpu.pipeline_mode<synchronous>, transform_indices = @transform_11, window_bounds = array<i64: 1, 128>}, {pipeline_mode = #tpu.pipeline_mode<synchronous>, transform_indices = @transform_12, window_bounds = array<i64: 128, 32>}, {pipeline_mode = #tpu.pipeline_mode<synchronous>, transform_indices = @transform_13, window_bounds = array<i64: 1, 32>}, {transform_indices = @transform_14, window_bounds = array<i64: 1, 8, 32>}]} {
    %c0_i32 = arith.constant 0 : i32
    %0 = arith.cmpi eq, %arg1, %c0_i32 : i32
    %1 = arith.extui %0 : i1 to i32
    %c0_i32_0 = arith.constant 0 : i32
    %2 = arith.cmpi ne, %1, %c0_i32_0 : i32
    scf.if %2 {
      %c0_54 = arith.constant 0 : index
      %c0_55 = arith.constant 0 : index
      %c0_56 = arith.constant 0 : index
      %121 = vector.load %arg2[%c0_54, %c0_55, %c0_56] : memref<1x16x32xf32, #tpu.memory_space<vmem>>, vector<1x16x32xf32>
      %122 = vector.shape_cast %121 : vector<1x16x32xf32> to vector<16x32xf32>
      %c0_57 = arith.constant 0 : index
      %c0_58 = arith.constant 0 : index
      %123 = vector.load %arg4[%c0_57, %c0_58] : memref<1x32xf32, #tpu.memory_space<vmem>>, vector<1x32xf32>
      %124 = vector.shape_cast %123 : vector<1x32xf32> to vector<32xf32>
      %c0_59 = arith.constant 0 : index
      %c0_60 = arith.constant 0 : index
      %125 = vector.load %arg5[%c0_59, %c0_60] : memref<1x32xf32, #tpu.memory_space<vmem>>, vector<1x32xf32>
      %126 = vector.shape_cast %125 : vector<1x32xf32> to vector<32xf32>
      %cst_61 = arith.constant dense<0.000000e+00> : vector<16xf32>
      %127 = vector.multi_reduction <add>, %122, %cst_61 [1] : vector<16x32xf32> to vector<16xf32>
      %128 = vector.shape_cast %127 : vector<16xf32> to vector<16x1xf32>
      %cst_62 = arith.constant 3.200000e+01 : f32
      %129 = vector.broadcast %cst_62 : f32 to vector<16x1xf32>
      %130 = arith.divf %128, %129 : vector<16x1xf32>
      %131 = vector.broadcast %130 : vector<16x1xf32> to vector<16x32xf32>
      %132 = arith.subf %122, %131 : vector<16x32xf32>
      %133 = arith.mulf %132, %132 : vector<16x32xf32>
      %cst_63 = arith.constant dense<0.000000e+00> : vector<16xf32>
      %134 = vector.multi_reduction <add>, %133, %cst_63 [1] : vector<16x32xf32> to vector<16xf32>
      %135 = vector.shape_cast %134 : vector<16xf32> to vector<16x1xf32>
      %cst_64 = arith.constant 3.200000e+01 : f32
      %136 = vector.broadcast %cst_64 : f32 to vector<16x1xf32>
      %137 = arith.divf %135, %136 : vector<16x1xf32>
      %138 = vector.broadcast %130 : vector<16x1xf32> to vector<16x32xf32>
      %139 = arith.subf %122, %138 : vector<16x32xf32>
      %cst_65 = arith.constant 9.99999974E-6 : f32
      %140 = vector.broadcast %cst_65 : f32 to vector<16x1xf32>
      %141 = arith.addf %137, %140 : vector<16x1xf32>
      %142 = math.rsqrt %141 : vector<16x1xf32>
      %143 = vector.broadcast %142 : vector<16x1xf32> to vector<16x32xf32>
      %144 = arith.mulf %139, %143 : vector<16x32xf32>
      %145 = vector.shape_cast %124 : vector<32xf32> to vector<1x32xf32>
      %146 = vector.broadcast %145 : vector<1x32xf32> to vector<16x32xf32>
      %147 = arith.mulf %144, %146 : vector<16x32xf32>
      %148 = vector.shape_cast %126 : vector<32xf32> to vector<1x32xf32>
      %149 = vector.broadcast %148 : vector<1x32xf32> to vector<16x32xf32>
      %150 = arith.addf %147, %149 : vector<16x32xf32>
      %151 = arith.truncf %150 : vector<16x32xf32> to vector<16x32xbf16>
      %c0_66 = arith.constant 0 : index
      %c0_67 = arith.constant 0 : index
      %152 = vector.load %arg6[%c0_66, %c0_67] : memref<32x96xbf16, #tpu.memory_space<vmem>>, vector<32x96xbf16>
      %cst_68 = arith.constant dense<0.000000e+00> : vector<16x96xf32>
      %153 = tpu.matmul %151, %152, %cst_68 {dimension_numbers = #tpu.dot_dimension_numbers<[1], [0], [0], [1], [0, 0, 1, 1], [], []>} : vector<16x32xbf16>, vector<32x96xbf16>, vector<16x96xf32> -> vector<16x96xf32>
      %c0_69 = arith.constant 0 : index
      %c0_70 = arith.constant 0 : index
      %154 = vector.load %arg7[%c0_69, %c0_70] : memref<1x96xf32, #tpu.memory_space<vmem>>, vector<1x96xf32>
      %155 = vector.shape_cast %154 : vector<1x96xf32> to vector<96xf32>
      %156 = vector.shape_cast %155 : vector<96xf32> to vector<1x96xf32>
      %157 = vector.broadcast %156 : vector<1x96xf32> to vector<16x96xf32>
      %158 = arith.addf %153, %157 : vector<16x96xf32>
      %159 = vector.extract_strided_slice %158 {offsets = [0, 0], sizes = [16, 32], strides = [1, 1]} : vector<16x96xf32> to vector<16x32xf32>
      %cst_71 = arith.constant 0.353553385 : f32
      %160 = vector.broadcast %cst_71 : f32 to vector<16x32xf32>
      %161 = arith.mulf %159, %160 : vector<16x32xf32>
      %162 = vector.extract_strided_slice %158 {offsets = [0, 32], sizes = [16, 32], strides = [1, 1]} : vector<16x96xf32> to vector<16x32xf32>
      %163 = vector.extract_strided_slice %158 {offsets = [0, 64], sizes = [16, 32], strides = [1, 1]} : vector<16x96xf32> to vector<16x32xf32>
      %164 = vector.extract_strided_slice %161 {offsets = [0, 0], sizes = [16, 8], strides = [1, 1]} : vector<16x32xf32> to vector<16x8xf32>
      %165 = arith.truncf %164 : vector<16x8xf32> to vector<16x8xbf16>
      %c0_72 = arith.constant 0 : index
      %c0_73 = arith.constant 0 : index
      %c0_74 = arith.constant 0 : index
      %166 = vector.load %arg17[%c0_72, %c0_73, %c0_74] : memref<4x16x8xbf16, #tpu.memory_space<vmem>>, vector<1x16x8xbf16>
      %167 = vector.shape_cast %166 : vector<1x16x8xbf16> to vector<16x8xbf16>
      %168 = vector.shape_cast %165 : vector<16x8xbf16> to vector<1x16x8xbf16>
      tpu.vector_store %arg17[%c0_72, %c0_73, %c0_74], %168 {strides = array<i32>} : memref<4x16x8xbf16, #tpu.memory_space<vmem>>, vector<1x16x8xbf16>,
      %169 = vector.extract_strided_slice %162 {offsets = [0, 0], sizes = [16, 8], strides = [1, 1]} : vector<16x32xf32> to vector<16x8xf32>
      %170 = arith.truncf %169 : vector<16x8xf32> to vector<16x8xbf16>
      %c0_75 = arith.constant 0 : index
      %c0_76 = arith.constant 0 : index
      %c0_77 = arith.constant 0 : index
      %171 = vector.load %arg18[%c0_75, %c0_76, %c0_77] : memref<4x16x8xbf16, #tpu.memory_space<vmem>>, vector<1x16x8xbf16>
      %172 = vector.shape_cast %171 : vector<1x16x8xbf16> to vector<16x8xbf16>
      %173 = vector.shape_cast %170 : vector<16x8xbf16> to vector<1x16x8xbf16>
      tpu.vector_store %arg18[%c0_75, %c0_76, %c0_77], %173 {strides = array<i32>} : memref<4x16x8xbf16, #tpu.memory_space<vmem>>, vector<1x16x8xbf16>,
      %174 = vector.extract_strided_slice %163 {offsets = [0, 0], sizes = [16, 8], strides = [1, 1]} : vector<16x32xf32> to vector<16x8xf32>
      %175 = arith.truncf %174 : vector<16x8xf32> to vector<16x8xbf16>
      %c0_78 = arith.constant 0 : index
      %c0_79 = arith.constant 0 : index
      %c0_80 = arith.constant 0 : index
      %176 = vector.load %arg19[%c0_78, %c0_79, %c0_80] : memref<4x16x8xbf16, #tpu.memory_space<vmem>>, vector<1x16x8xbf16>
      %177 = vector.shape_cast %176 : vector<1x16x8xbf16> to vector<16x8xbf16>
      %178 = vector.shape_cast %175 : vector<16x8xbf16> to vector<1x16x8xbf16>
      tpu.vector_store %arg19[%c0_78, %c0_79, %c0_80], %178 {strides = array<i32>} : memref<4x16x8xbf16, #tpu.memory_space<vmem>>, vector<1x16x8xbf16>,
      %179 = vector.extract_strided_slice %161 {offsets = [0, 8], sizes = [16, 8], strides = [1, 1]} : vector<16x32xf32> to vector<16x8xf32>
      %180 = arith.truncf %179 : vector<16x8xf32> to vector<16x8xbf16>
      %c1 = arith.constant 1 : index
      %c0_81 = arith.constant 0 : index
      %c0_82 = arith.constant 0 : index
      %181 = vector.load %arg17[%c1, %c0_81, %c0_82] : memref<4x16x8xbf16, #tpu.memory_space<vmem>>, vector<1x16x8xbf16>
      %182 = vector.shape_cast %181 : vector<1x16x8xbf16> to vector<16x8xbf16>
      %183 = vector.shape_cast %180 : vector<16x8xbf16> to vector<1x16x8xbf16>
      tpu.vector_store %arg17[%c1, %c0_81, %c0_82], %183 {strides = array<i32>} : memref<4x16x8xbf16, #tpu.memory_space<vmem>>, vector<1x16x8xbf16>,
      %184 = vector.extract_strided_slice %162 {offsets = [0, 8], sizes = [16, 8], strides = [1, 1]} : vector<16x32xf32> to vector<16x8xf32>
      %185 = arith.truncf %184 : vector<16x8xf32> to vector<16x8xbf16>
      %c1_83 = arith.constant 1 : index
      %c0_84 = arith.constant 0 : index
      %c0_85 = arith.constant 0 : index
      %186 = vector.load %arg18[%c1_83, %c0_84, %c0_85] : memref<4x16x8xbf16, #tpu.memory_space<vmem>>, vector<1x16x8xbf16>
      %187 = vector.shape_cast %186 : vector<1x16x8xbf16> to vector<16x8xbf16>
      %188 = vector.shape_cast %185 : vector<16x8xbf16> to vector<1x16x8xbf16>
      tpu.vector_store %arg18[%c1_83, %c0_84, %c0_85], %188 {strides = array<i32>} : memref<4x16x8xbf16, #tpu.memory_space<vmem>>, vector<1x16x8xbf16>,
      %189 = vector.extract_strided_slice %163 {offsets = [0, 8], sizes = [16, 8], strides = [1, 1]} : vector<16x32xf32> to vector<16x8xf32>
      %190 = arith.truncf %189 : vector<16x8xf32> to vector<16x8xbf16>
      %c1_86 = arith.constant 1 : index
      %c0_87 = arith.constant 0 : index
      %c0_88 = arith.constant 0 : index
      %191 = vector.load %arg19[%c1_86, %c0_87, %c0_88] : memref<4x16x8xbf16, #tpu.memory_space<vmem>>, vector<1x16x8xbf16>
      %192 = vector.shape_cast %191 : vector<1x16x8xbf16> to vector<16x8xbf16>
      %193 = vector.shape_cast %190 : vector<16x8xbf16> to vector<1x16x8xbf16>
      tpu.vector_store %arg19[%c1_86, %c0_87, %c0_88], %193 {strides = array<i32>} : memref<4x16x8xbf16, #tpu.memory_space<vmem>>, vector<1x16x8xbf16>,
      %194 = vector.extract_strided_slice %161 {offsets = [0, 16], sizes = [16, 8], strides = [1, 1]} : vector<16x32xf32> to vector<16x8xf32>
      %195 = arith.truncf %194 : vector<16x8xf32> to vector<16x8xbf16>
      %c2 = arith.constant 2 : index
      %c0_89 = arith.constant 0 : index
      %c0_90 = arith.constant 0 : index
      %196 = vector.load %arg17[%c2, %c0_89, %c0_90] : memref<4x16x8xbf16, #tpu.memory_space<vmem>>, vector<1x16x8xbf16>
      %197 = vector.shape_cast %196 : vector<1x16x8xbf16> to vector<16x8xbf16>
      %198 = vector.shape_cast %195 : vector<16x8xbf16> to vector<1x16x8xbf16>
      tpu.vector_store %arg17[%c2, %c0_89, %c0_90], %198 {strides = array<i32>} : memref<4x16x8xbf16, #tpu.memory_space<vmem>>, vector<1x16x8xbf16>,
      %199 = vector.extract_strided_slice %162 {offsets = [0, 16], sizes = [16, 8], strides = [1, 1]} : vector<16x32xf32> to vector<16x8xf32>
      %200 = arith.truncf %199 : vector<16x8xf32> to vector<16x8xbf16>
      %c2_91 = arith.constant 2 : index
      %c0_92 = arith.constant 0 : index
      %c0_93 = arith.constant 0 : index
      %201 = vector.load %arg18[%c2_91, %c0_92, %c0_93] : memref<4x16x8xbf16, #tpu.memory_space<vmem>>, vector<1x16x8xbf16>
      %202 = vector.shape_cast %201 : vector<1x16x8xbf16> to vector<16x8xbf16>
      %203 = vector.shape_cast %200 : vector<16x8xbf16> to vector<1x16x8xbf16>
      tpu.vector_store %arg18[%c2_91, %c0_92, %c0_93], %203 {strides = array<i32>} : memref<4x16x8xbf16, #tpu.memory_space<vmem>>, vector<1x16x8xbf16>,
      %204 = vector.extract_strided_slice %163 {offsets = [0, 16], sizes = [16, 8], strides = [1, 1]} : vector<16x32xf32> to vector<16x8xf32>
      %205 = arith.truncf %204 : vector<16x8xf32> to vector<16x8xbf16>
      %c2_94 = arith.constant 2 : index
      %c0_95 = arith.constant 0 : index
      %c0_96 = arith.constant 0 : index
      %206 = vector.load %arg19[%c2_94, %c0_95, %c0_96] : memref<4x16x8xbf16, #tpu.memory_space<vmem>>, vector<1x16x8xbf16>
      %207 = vector.shape_cast %206 : vector<1x16x8xbf16> to vector<16x8xbf16>
      %208 = vector.shape_cast %205 : vector<16x8xbf16> to vector<1x16x8xbf16>
      tpu.vector_store %arg19[%c2_94, %c0_95, %c0_96], %208 {strides = array<i32>} : memref<4x16x8xbf16, #tpu.memory_space<vmem>>, vector<1x16x8xbf16>,
      %209 = vector.extract_strided_slice %161 {offsets = [0, 24], sizes = [16, 8], strides = [1, 1]} : vector<16x32xf32> to vector<16x8xf32>
      %210 = arith.truncf %209 : vector<16x8xf32> to vector<16x8xbf16>
      %c3 = arith.constant 3 : index
      %c0_97 = arith.constant 0 : index
      %c0_98 = arith.constant 0 : index
      %211 = vector.load %arg17[%c3, %c0_97, %c0_98] : memref<4x16x8xbf16, #tpu.memory_space<vmem>>, vector<1x16x8xbf16>
      %212 = vector.shape_cast %211 : vector<1x16x8xbf16> to vector<16x8xbf16>
      %213 = vector.shape_cast %210 : vector<16x8xbf16> to vector<1x16x8xbf16>
      tpu.vector_store %arg17[%c3, %c0_97, %c0_98], %213 {strides = array<i32>} : memref<4x16x8xbf16, #tpu.memory_space<vmem>>, vector<1x16x8xbf16>,
      %214 = vector.extract_strided_slice %162 {offsets = [0, 24], sizes = [16, 8], strides = [1, 1]} : vector<16x32xf32> to vector<16x8xf32>
      %215 = arith.truncf %214 : vector<16x8xf32> to vector<16x8xbf16>
      %c3_99 = arith.constant 3 : index
      %c0_100 = arith.constant 0 : index
      %c0_101 = arith.constant 0 : index
      %216 = vector.load %arg18[%c3_99, %c0_100, %c0_101] : memref<4x16x8xbf16, #tpu.memory_space<vmem>>, vector<1x16x8xbf16>
      %217 = vector.shape_cast %216 : vector<1x16x8xbf16> to vector<16x8xbf16>
      %218 = vector.shape_cast %215 : vector<16x8xbf16> to vector<1x16x8xbf16>
      tpu.vector_store %arg18[%c3_99, %c0_100, %c0_101], %218 {strides = array<i32>} : memref<4x16x8xbf16, #tpu.memory_space<vmem>>, vector<1x16x8xbf16>,
      %219 = vector.extract_strided_slice %163 {offsets = [0, 24], sizes = [16, 8], strides = [1, 1]} : vector<16x32xf32> to vector<16x8xf32>
      %220 = arith.truncf %219 : vector<16x8xf32> to vector<16x8xbf16>
      %c3_102 = arith.constant 3 : index
      %c0_103 = arith.constant 0 : index
      %c0_104 = arith.constant 0 : index
      %221 = vector.load %arg19[%c3_102, %c0_103, %c0_104] : memref<4x16x8xbf16, #tpu.memory_space<vmem>>, vector<1x16x8xbf16>
      %222 = vector.shape_cast %221 : vector<1x16x8xbf16> to vector<16x8xbf16>
      %223 = vector.shape_cast %220 : vector<16x8xbf16> to vector<1x16x8xbf16>
      tpu.vector_store %arg19[%c3_102, %c0_103, %c0_104], %223 {strides = array<i32>} : memref<4x16x8xbf16, #tpu.memory_space<vmem>>, vector<1x16x8xbf16>,
    } else {
    }
    %c8_i32 = arith.constant 8 : i32
    %3 = arith.muli %arg1, %c8_i32 : i32
    %4 = tpu.assume_multiple %3, 8 : i32
    %c0 = arith.constant 0 : index
    %5 = arith.index_cast %4 : i32 to index
    %c0_1 = arith.constant 0 : index
    %6 = vector.load %arg17[%c0, %5, %c0_1] : memref<4x16x8xbf16, #tpu.memory_space<vmem>>, vector<4x8x8xbf16>
    %c0_2 = arith.constant 0 : index
    %c0_3 = arith.constant 0 : index
    %c0_4 = arith.constant 0 : index
    %7 = vector.load %arg18[%c0_2, %c0_3, %c0_4] : memref<4x16x8xbf16, #tpu.memory_space<vmem>>, vector<4x16x8xbf16>
    "tpu.trace_start"() <{level = 10 : i32, message = "htd,hsd->hts"}> : () -> ()
    %cst = arith.constant dense<0.000000e+00> : vector<4x8x16xf32>
    %8 = tpu.matmul %6, %7, %cst {dimension_numbers = #tpu.dot_dimension_numbers<[2], [2], [1], [1], [0, 0, 0, 1, 1, 1], [0], [0]>} : vector<4x8x8xbf16>, vector<4x16x8xbf16>, vector<4x8x16xf32> -> vector<4x8x16xf32>
    "tpu.trace_stop"() : () -> ()
    %c8_i32_5 = arith.constant 8 : i32
    %9 = arith.muli %arg1, %c8_i32_5 : i32
    %10 = tpu.iota {dimensions = array<i32: 0>} : vector<8x16xi32>
    %11 = vector.broadcast %9 : i32 to vector<8x16xi32>
    %12 = arith.addi %11, %10 : vector<8x16xi32>
    %13 = tpu.iota {dimensions = array<i32: 1>} : vector<8x16xi32>
    %14 = arith.cmpi sle, %13, %12 : vector<8x16xi32>
    %15 = vector.shape_cast %14 : vector<8x16xi1> to vector<1x8x16xi1>
    %cst_6 = arith.constant 0xFF800000 : f32
    %16 = vector.shape_cast %15 : vector<1x8x16xi1> to vector<1x8x16xi1>
    %17 = vector.broadcast %16 : vector<1x8x16xi1> to vector<4x8x16xi1>
    %18 = vector.broadcast %cst_6 : f32 to vector<4x8x16xf32>
    %19 = arith.select %17, %8, %18 : vector<4x8x16xi1>, vector<4x8x16xf32>
    %cst_7 = arith.constant dense<0xFF800000> : vector<4x8xf32>
    %20 = vector.multi_reduction <maximumf>, %19, %cst_7 [2] : vector<4x8x16xf32> to vector<4x8xf32>
    %21 = vector.shape_cast %20 : vector<4x8xf32> to vector<4x8x1xf32>
    %22 = vector.broadcast %21 : vector<4x8x1xf32> to vector<4x8x16xf32>
    %23 = arith.subf %19, %22 : vector<4x8x16xf32>
    %24 = math.exp %23 : vector<4x8x16xf32>
    %cst_8 = arith.constant dense<0.000000e+00> : vector<4x8xf32>
    %25 = vector.multi_reduction <add>, %24, %cst_8 [2] : vector<4x8x16xf32> to vector<4x8xf32>
    %26 = vector.shape_cast %25 : vector<4x8xf32> to vector<4x8x1xf32>
    %27 = tpu.reciprocal %26 {approx = true} : vector<4x8x1xf32> -> vector<4x8x1xf32>
    %28 = vector.broadcast %27 : vector<4x8x1xf32> to vector<4x8x16xf32>
    %29 = arith.mulf %24, %28 : vector<4x8x16xf32>
    %30 = arith.truncf %29 : vector<4x8x16xf32> to vector<4x8x16xbf16>
    %c0_9 = arith.constant 0 : index
    %c0_10 = arith.constant 0 : index
    %c0_11 = arith.constant 0 : index
    %31 = vector.load %arg19[%c0_9, %c0_10, %c0_11] : memref<4x16x8xbf16, #tpu.memory_space<vmem>>, vector<4x16x8xbf16>
    "tpu.trace_start"() <{level = 10 : i32, message = "hts,hsd->htd"}> : () -> ()
    %cst_12 = arith.constant dense<0.000000e+00> : vector<4x8x8xf32>
    %32 = tpu.matmul %30, %31, %cst_12 {dimension_numbers = #tpu.dot_dimension_numbers<[2], [1], [1], [2], [0, 0, 0, 1, 1, 2], [0], [0]>} : vector<4x8x16xbf16>, vector<4x16x8xbf16>, vector<4x8x8xf32> -> vector<4x8x8xf32>
    "tpu.trace_stop"() : () -> ()
    %33 = vector.extract_strided_slice %32 {offsets = [0, 0, 0], sizes = [1, 8, 8], strides = [1, 1, 1]} : vector<4x8x8xf32> to vector<1x8x8xf32>
    %34 = vector.shape_cast %33 : vector<1x8x8xf32> to vector<8x8xf32>
    %35 = arith.truncf %34 : vector<8x8xf32> to vector<8x8xbf16>
    %c0_13 = arith.constant 0 : index
    %c0_14 = arith.constant 0 : index
    %36 = vector.load %arg20[%c0_13, %c0_14] : memref<8x32xbf16, #tpu.memory_space<vmem>>, vector<8x8xbf16>
    tpu.vector_store %arg20[%c0_13, %c0_14], %35 {strides = array<i32>} : memref<8x32xbf16, #tpu.memory_space<vmem>>, vector<8x8xbf16>,
    %37 = vector.extract_strided_slice %32 {offsets = [1, 0, 0], sizes = [1, 8, 8], strides = [1, 1, 1]} : vector<4x8x8xf32> to vector<1x8x8xf32>
    %38 = vector.shape_cast %37 : vector<1x8x8xf32> to vector<8x8xf32>
    %39 = arith.truncf %38 : vector<8x8xf32> to vector<8x8xbf16>
    %c0_15 = arith.constant 0 : index
    %c8 = arith.constant 8 : index
    %40 = vector.load %arg20[%c0_15, %c8] : memref<8x32xbf16, #tpu.memory_space<vmem>>, vector<8x8xbf16>
    tpu.vector_store %arg20[%c0_15, %c8], %39 {strides = array<i32>} : memref<8x32xbf16, #tpu.memory_space<vmem>>, vector<8x8xbf16>,
    %41 = vector.extract_strided_slice %32 {offsets = [2, 0, 0], sizes = [1, 8, 8], strides = [1, 1, 1]} : vector<4x8x8xf32> to vector<1x8x8xf32>
    %42 = vector.shape_cast %41 : vector<1x8x8xf32> to vector<8x8xf32>
    %43 = arith.truncf %42 : vector<8x8xf32> to vector<8x8xbf16>
    %c0_16 = arith.constant 0 : index
    %c16 = arith.constant 16 : index
    %44 = vector.load %arg20[%c0_16, %c16] : memref<8x32xbf16, #tpu.memory_space<vmem>>, vector<8x8xbf16>
    tpu.vector_store %arg20[%c0_16, %c16], %43 {strides = array<i32>} : memref<8x32xbf16, #tpu.memory_space<vmem>>, vector<8x8xbf16>,
    %45 = vector.extract_strided_slice %32 {offsets = [3, 0, 0], sizes = [1, 8, 8], strides = [1, 1, 1]} : vector<4x8x8xf32> to vector<1x8x8xf32>
    %46 = vector.shape_cast %45 : vector<1x8x8xf32> to vector<8x8xf32>
    %47 = arith.truncf %46 : vector<8x8xf32> to vector<8x8xbf16>
    %c0_17 = arith.constant 0 : index
    %c24 = arith.constant 24 : index
    %48 = vector.load %arg20[%c0_17, %c24] : memref<8x32xbf16, #tpu.memory_space<vmem>>, vector<8x8xbf16>
    tpu.vector_store %arg20[%c0_17, %c24], %47 {strides = array<i32>} : memref<8x32xbf16, #tpu.memory_space<vmem>>, vector<8x8xbf16>,
    %c0_18 = arith.constant 0 : index
    %c0_19 = arith.constant 0 : index
    %c0_20 = arith.constant 0 : index
    %49 = vector.load %arg3[%c0_18, %c0_19, %c0_20] : memref<1x8x32xf32, #tpu.memory_space<vmem>>, vector<1x8x32xf32>
    %50 = vector.shape_cast %49 : vector<1x8x32xf32> to vector<8x32xf32>
    %c0_21 = arith.constant 0 : index
    %c0_22 = arith.constant 0 : index
    %51 = vector.load %arg20[%c0_21, %c0_22] : memref<8x32xbf16, #tpu.memory_space<vmem>>, vector<8x32xbf16>
    %c0_23 = arith.constant 0 : index
    %c0_24 = arith.constant 0 : index
    %52 = vector.load %arg8[%c0_23, %c0_24] : memref<32x32xbf16, #tpu.memory_space<vmem>>, vector<32x32xbf16>
    %cst_25 = arith.constant dense<0.000000e+00> : vector<8x32xf32>
    %53 = tpu.matmul %51, %52, %cst_25 {dimension_numbers = #tpu.dot_dimension_numbers<[1], [0], [0], [1], [0, 0, 1, 1], [], []>} : vector<8x32xbf16>, vector<32x32xbf16>, vector<8x32xf32> -> vector<8x32xf32>
    %c0_26 = arith.constant 0 : index
    %c0_27 = arith.constant 0 : index
    %54 = vector.load %arg9[%c0_26, %c0_27] : memref<1x32xf32, #tpu.memory_space<vmem>>, vector<1x32xf32>
    %55 = vector.shape_cast %54 : vector<1x32xf32> to vector<32xf32>
    %56 = vector.shape_cast %55 : vector<32xf32> to vector<1x32xf32>
    %57 = vector.broadcast %56 : vector<1x32xf32> to vector<8x32xf32>
    %58 = arith.addf %53, %57 : vector<8x32xf32>
    %59 = arith.addf %50, %58 : vector<8x32xf32>
    %c0_28 = arith.constant 0 : index
    %c0_29 = arith.constant 0 : index
    %60 = vector.load %arg10[%c0_28, %c0_29] : memref<1x32xf32, #tpu.memory_space<vmem>>, vector<1x32xf32>
    %61 = vector.shape_cast %60 : vector<1x32xf32> to vector<32xf32>
    %c0_30 = arith.constant 0 : index
    %c0_31 = arith.constant 0 : index
    %62 = vector.load %arg11[%c0_30, %c0_31] : memref<1x32xf32, #tpu.memory_space<vmem>>, vector<1x32xf32>
    %63 = vector.shape_cast %62 : vector<1x32xf32> to vector<32xf32>
    %cst_32 = arith.constant dense<0.000000e+00> : vector<8xf32>
    %64 = vector.multi_reduction <add>, %59, %cst_32 [1] : vector<8x32xf32> to vector<8xf32>
    %65 = vector.shape_cast %64 : vector<8xf32> to vector<8x1xf32>
    %cst_33 = arith.constant 3.200000e+01 : f32
    %66 = vector.broadcast %cst_33 : f32 to vector<8x1xf32>
    %67 = arith.divf %65, %66 : vector<8x1xf32>
    %68 = vector.broadcast %67 : vector<8x1xf32> to vector<8x32xf32>
    %69 = arith.subf %59, %68 : vector<8x32xf32>
    %70 = arith.mulf %69, %69 : vector<8x32xf32>
    %cst_34 = arith.constant dense<0.000000e+00> : vector<8xf32>
    %71 = vector.multi_reduction <add>, %70, %cst_34 [1] : vector<8x32xf32> to vector<8xf32>
    %72 = vector.shape_cast %71 : vector<8xf32> to vector<8x1xf32>
    %cst_35 = arith.constant 3.200000e+01 : f32
    %73 = vector.broadcast %cst_35 : f32 to vector<8x1xf32>
    %74 = arith.divf %72, %73 : vector<8x1xf32>
    %75 = vector.broadcast %67 : vector<8x1xf32> to vector<8x32xf32>
    %76 = arith.subf %59, %75 : vector<8x32xf32>
    %cst_36 = arith.constant 9.99999974E-6 : f32
    %77 = vector.broadcast %cst_36 : f32 to vector<8x1xf32>
    %78 = arith.addf %74, %77 : vector<8x1xf32>
    %79 = math.rsqrt %78 : vector<8x1xf32>
    %80 = vector.broadcast %79 : vector<8x1xf32> to vector<8x32xf32>
    %81 = arith.mulf %76, %80 : vector<8x32xf32>
    %82 = vector.shape_cast %61 : vector<32xf32> to vector<1x32xf32>
    %83 = vector.broadcast %82 : vector<1x32xf32> to vector<8x32xf32>
    %84 = arith.mulf %81, %83 : vector<8x32xf32>
    %85 = vector.shape_cast %63 : vector<32xf32> to vector<1x32xf32>
    %86 = vector.broadcast %85 : vector<1x32xf32> to vector<8x32xf32>
    %87 = arith.addf %84, %86 : vector<8x32xf32>
    %88 = arith.truncf %87 : vector<8x32xf32> to vector<8x32xbf16>
    %c0_37 = arith.constant 0 : index
    %c0_38 = arith.constant 0 : index
    %89 = vector.load %arg12[%c0_37, %c0_38] : memref<32x128xbf16, #tpu.memory_space<vmem>>, vector<32x128xbf16>
    %cst_39 = arith.constant dense<0.000000e+00> : vector<8x128xf32>
    %90 = tpu.matmul %88, %89, %cst_39 {dimension_numbers = #tpu.dot_dimension_numbers<[1], [0], [0], [1], [0, 0, 1, 1], [], []>} : vector<8x32xbf16>, vector<32x128xbf16>, vector<8x128xf32> -> vector<8x128xf32>
    %c0_40 = arith.constant 0 : index
    %c0_41 = arith.constant 0 : index
    %91 = vector.load %arg13[%c0_40, %c0_41] : memref<1x128xf32, #tpu.memory_space<vmem>>, vector<1x128xf32>
    %92 = vector.shape_cast %91 : vector<1x128xf32> to vector<128xf32>
    %93 = vector.shape_cast %92 : vector<128xf32> to vector<1x128xf32>
    %94 = vector.broadcast %93 : vector<1x128xf32> to vector<8x128xf32>
    %95 = arith.addf %90, %94 : vector<8x128xf32>
    %cst_42 = arith.constant 5.000000e-01 : f32
    %96 = vector.broadcast %cst_42 : f32 to vector<8x128xf32>
    %97 = arith.mulf %96, %95 : vector<8x128xf32>
    %cst_43 = arith.constant 4.471500e-02 : f32
    %98 = vector.broadcast %cst_43 : f32 to vector<8x128xf32>
    %99 = arith.mulf %98, %95 : vector<8x128xf32>
    %100 = arith.mulf %99, %95 : vector<8x128xf32>
    %101 = arith.mulf %100, %95 : vector<8x128xf32>
    %102 = arith.addf %95, %101 : vector<8x128xf32>
    %cst_44 = arith.constant 0.797884583 : f32
    %103 = vector.broadcast %cst_44 : f32 to vector<8x128xf32>
    %104 = arith.mulf %103, %102 : vector<8x128xf32>
    %105 = math.tanh %104 : vector<8x128xf32>
    %cst_45 = arith.constant 1.000000e+00 : f32
    %106 = vector.broadcast %cst_45 : f32 to vector<8x128xf32>
    %107 = arith.addf %106, %105 : vector<8x128xf32>
    %108 = arith.mulf %97, %107 : vector<8x128xf32>
    %109 = arith.truncf %108 : vector<8x128xf32> to vector<8x128xbf16>
    %c0_46 = arith.constant 0 : index
    %c0_47 = arith.constant 0 : index
    %110 = vector.load %arg14[%c0_46, %c0_47] : memref<128x32xbf16, #tpu.memory_space<vmem>>, vector<128x32xbf16>
    %cst_48 = arith.constant dense<0.000000e+00> : vector<8x32xf32>
    %111 = tpu.matmul %109, %110, %cst_48 {dimension_numbers = #tpu.dot_dimension_numbers<[1], [0], [0], [1], [0, 0, 1, 1], [], []>} : vector<8x128xbf16>, vector<128x32xbf16>, vector<8x32xf32> -> vector<8x32xf32>
    %c0_49 = arith.constant 0 : index
    %c0_50 = arith.constant 0 : index
    %112 = vector.load %arg15[%c0_49, %c0_50] : memref<1x32xf32, #tpu.memory_space<vmem>>, vector<1x32xf32>
    %113 = vector.shape_cast %112 : vector<1x32xf32> to vector<32xf32>
    %114 = vector.shape_cast %113 : vector<32xf32> to vector<1x32xf32>
    %115 = vector.broadcast %114 : vector<1x32xf32> to vector<8x32xf32>
    %116 = arith.addf %111, %115 : vector<8x32xf32>
    %117 = arith.addf %59, %116 : vector<8x32xf32>
    %c0_51 = arith.constant 0 : index
    %c0_52 = arith.constant 0 : index
    %c0_53 = arith.constant 0 : index
    %118 = vector.load %arg16[%c0_51, %c0_52, %c0_53] : memref<1x8x32xf32, #tpu.memory_space<vmem>>, vector<1x8x32xf32>
    %119 = vector.shape_cast %118 : vector<1x8x32xf32> to vector<8x32xf32>
    %120 = vector.shape_cast %117 : vector<8x32xf32> to vector<1x8x32xf32>
    tpu.vector_store %arg16[%c0_51, %c0_52, %c0_53], %120 {strides = array<i32>} : memref<1x8x32xf32, #tpu.memory_space<vmem>>, vector<1x8x32xf32>,
    return
  }
  func.func @transform_0(%arg0: i32, %arg1: i32) -> (i32, i32, i32) {
    %c0_i32 = arith.constant 0 : i32
    %c0_i32_0 = arith.constant 0 : i32
    %c0_i32_1 = arith.constant 0 : i32
    return %arg0, %c0_i32, %c0_i32_0 : i32, i32, i32
  }
  func.func @transform_1(%arg0: i32, %arg1: i32) -> (i32, i32, i32) {
    %c0_i32 = arith.constant 0 : i32
    %c0_i32_0 = arith.constant 0 : i32
    return %arg0, %arg1, %c0_i32 : i32, i32, i32
  }
  func.func @transform_2(%arg0: i32, %arg1: i32) -> (i32, i32) {
    %c0_i32 = arith.constant 0 : i32
    %c0_i32_0 = arith.constant 0 : i32
    %c0_i32_1 = arith.constant 0 : i32
    return %c0_i32, %c0_i32_0 : i32, i32
  }
  func.func @transform_3(%arg0: i32, %arg1: i32) -> (i32, i32) {
    %c0_i32 = arith.constant 0 : i32
    %c0_i32_0 = arith.constant 0 : i32
    %c0_i32_1 = arith.constant 0 : i32
    return %c0_i32, %c0_i32_0 : i32, i32
  }
  func.func @transform_4(%arg0: i32, %arg1: i32) -> (i32, i32) {
    %c0_i32 = arith.constant 0 : i32
    %c0_i32_0 = arith.constant 0 : i32
    %c0_i32_1 = arith.constant 0 : i32
    return %c0_i32, %c0_i32_0 : i32, i32
  }
  func.func @transform_5(%arg0: i32, %arg1: i32) -> (i32, i32) {
    %c0_i32 = arith.constant 0 : i32
    %c0_i32_0 = arith.constant 0 : i32
    %c0_i32_1 = arith.constant 0 : i32
    return %c0_i32, %c0_i32_0 : i32, i32
  }
  func.func @transform_6(%arg0: i32, %arg1: i32) -> (i32, i32) {
    %c0_i32 = arith.constant 0 : i32
    %c0_i32_0 = arith.constant 0 : i32
    %c0_i32_1 = arith.constant 0 : i32
    return %c0_i32, %c0_i32_0 : i32, i32
  }
  func.func @transform_7(%arg0: i32, %arg1: i32) -> (i32, i32) {
    %c0_i32 = arith.constant 0 : i32
    %c0_i32_0 = arith.constant 0 : i32
    %c0_i32_1 = arith.constant 0 : i32
    return %c0_i32, %c0_i32_0 : i32, i32
  }
  func.func @transform_8(%arg0: i32, %arg1: i32) -> (i32, i32) {
    %c0_i32 = arith.constant 0 : i32
    %c0_i32_0 = arith.constant 0 : i32
    %c0_i32_1 = arith.constant 0 : i32
    return %c0_i32, %c0_i32_0 : i32, i32
  }
  func.func @transform_9(%arg0: i32, %arg1: i32) -> (i32, i32) {
    %c0_i32 = arith.constant 0 : i32
    %c0_i32_0 = arith.constant 0 : i32
    %c0_i32_1 = arith.constant 0 : i32
    return %c0_i32, %c0_i32_0 : i32, i32
  }
  func.func @transform_10(%arg0: i32, %arg1: i32) -> (i32, i32) {
    %c0_i32 = arith.constant 0 : i32
    %c0_i32_0 = arith.constant 0 : i32
    %c0_i32_1 = arith.constant 0 : i32
    return %c0_i32, %c0_i32_0 : i32, i32
  }
  func.func @transform_11(%arg0: i32, %arg1: i32) -> (i32, i32) {
    %c0_i32 = arith.constant 0 : i32
    %c0_i32_0 = arith.constant 0 : i32
    %c0_i32_1 = arith.constant 0 : i32
    return %c0_i32, %c0_i32_0 : i32, i32
  }
  func.func @transform_12(%arg0: i32, %arg1: i32) -> (i32, i32) {
    %c0_i32 = arith.constant 0 : i32
    %c0_i32_0 = arith.constant 0 : i32
    %c0_i32_1 = arith.constant 0 : i32
    return %c0_i32, %c0_i32_0 : i32, i32
  }
  func.func @transform_13(%arg0: i32, %arg1: i32) -> (i32, i32) {
    %c0_i32 = arith.constant 0 : i32
    %c0_i32_0 = arith.constant 0 : i32
    %c0_i32_1 = arith.constant 0 : i32
    return %c0_i32, %c0_i32_0 : i32, i32
  }
  func.func @transform_14(%arg0: i32, %arg1: i32) -> (i32, i32, i32) {
    %c0_i32 = arith.constant 0 : i32
    %c0_i32_0 = arith.constant 0 : i32
    return %arg0, %arg1, %c0_i32 : i32, i32, i32
  }
}

</mosaic_0001>

<bundles_post_ra>
// kernel: tpu_custom_call.1
= control target key start
LH: loop header
LB: loop body
LE: loop exit
PB: predicated region body
PF: predicated region fallthrough
CT: control target
= control target key end

     0   :  { %s2832_s0 = inlined_call_operand.vmem [shape: f32[2,16,32], index: 0, kind: input, shape index: {}]   ;;  %s2833_s1 = inlined_call_operand.vmem [shape: f32[2,16,32], index: 1, kind: input, shape index: {}]   ;;  %s2834_s2 = inlined_call_operand.vmem [shape: f32[1,32], index: 2, kind: input, shape index: {}]   ;;  %s2835_s3 = inlined_call_operand.vmem [shape: f32[1,32], index: 3, kind: input, shape index: {}]   ;;  %s2836_s4 = inlined_call_operand.vmem [shape: bf16[32,96], index: 4, kind: input, shape index: {}]   ;;  %s2837_s5 = inlined_call_operand.vmem [shape: f32[1,96], index: 5, kind: input, shape index: {}]   ;;  %s2838_s6 = inlined_call_operand.hbm [shape: bf16[32,32], index: 6, kind: input, shape index: {}]   ;;  %s2839_s7 = inlined_call_operand.vmem [shape: f32[1,32], index: 7, kind: input, shape index: {}]   ;;  %s2840_s8 = inlined_call_operand.vmem [shape: f32[1,32], index: 8, kind: input, shape index: {}]   ;;  %s2841_s9 = inlined_call_operand.hbm [shape: f32[1,32], index: 9, kind: input, shape index: {}]   ;;  %s2842_s10 = inlined_call_operand.hbm [shape: bf16[32,128], index: 10, kind: input, shape index: {}]   ;;  %s2843_s11 = inlined_call_operand.hbm [shape: f32[1,128], index: 11, kind: input, shape index: {}]   ;;  %s2844_s12 = inlined_call_operand.vmem [shape: bf16[128,32], index: 12, kind: input, shape index: {}]   ;;  %s2845_s13 = inlined_call_operand.vmem [shape: f32[1,32], index: 13, kind: input, shape index: {}]   ;;  %s2846_s14 = inlined_call_operand.hbm [shape: f32[2,16,32], index: 14, kind: output, shape index: {}]  }
   0x1   :  { %2856 = sst [smem:[#allocation27_spill]] %s2838_s6 }
   0x2   :  { %2857 = sst [smem:[#allocation28_spill]] %s2841_s9 }
   0x3   :  { %2858 = sst [smem:[#allocation29_spill]] %s2845_s13 }
   0x4   :  { %2859 = sst [smem:[#allocation30_spill]] %s2846_s14 }
   0x5   :  { %19 = vsyncpa [#allocation7], 0 }
   0x6   :  { %20 = vsyncpa [#allocation10], 0 }
   0x7   :  { %21 = vsyncpa [#allocation13], 0 }
   0x8   :  { %22 = vsyncpa [#allocation8], 0 }
   0x9   :  { %24 = vsyncpa [#allocation8 + $0x1], 0  ;;  %s2456_s29 = smov 0   ;;  %s2458_s30 = smov 0  }
   0xa   :  { %s2460_s15 = smov 0   ;;  %s2462_s16 = smov 0  }
   0xb   :  { %s2464_s17 = smov 0   ;;  %s2466_s18 = smov 0  }
   0xc   :  { %s2468_s19 = smov 0   ;;  %s2470_s20 = smov 0  }
   0xd LB: > { %2860 = sst [smem:[#allocation19_spill]] %s2326_s29  ;;  %s1760_s21 = sadd.s32 4294967295, %s2354_s20   ;;  %s2354_s20 = sphi %s2470_s20, %s30_s20   ;;  %s2350_s19 = sphi %s2468_s19, %s2887_s19   ;;  %s2346_s18 = sphi %s2466_s18, %s2886_s18   ;;  %s2342_s17 = sphi %s2464_s17, %s2885_s17   ;;  %s2338_s16 = sphi %s2462_s16, %s2884_s16   ;;  %s2334_s15 = sphi %s2460_s15, %s2883_s15   ;;  %s2330_s30 = sphi %s2458_s30, %s2889_s30   ;;  %s2326_s29 = sphi %s2456_s29, %s2888_s29  }
   0xe   : > { %2861 = sst [smem:[#allocation20_spill]] %s2334_s15  ;;  %s1761_s22 = sadd.s32 4294967294, %s2354_s20  }
   0xf   : > { %2862 = sst [smem:[#allocation21_spill]] %s2346_s18  ;;  %s39_s23 = sadd.s32 1, %s2346_s18 }
  0x10   : > { %2863 = sst [smem:[#allocation22_spill]] %s2350_s19  ;;  %s42_s24 = sadd.s32 1, %s2350_s19 }
  0x11   : > { %p40_p0 = scmp.ge.s32.totalorder %s39_s23, 2  ;;  %s357_s25 = sadd.s32 1, %s2334_s15 }
  0x12   : > { %p367_p1 = scmp.ne.s32.totalorder %s2334_s15, %s2330_s30  ;;  %p368_p2 = scmp.eq.s32.totalorder %s1760_s21, 3 }
  0x13   : > { %s2891_s23 = smov (%p40_p0, %s39_s23), 0  ;;  %s2893_s24 = smov (!%p40_p0, %s42_s24), %s2350_s19 }
  0x14   : > { %2864 = sst [smem:[#allocation23_spill]] %s2891_s23  ;;  %s353_s26 = ssub.s32 %s2346_s18, %s2891_s23 }
  0x15   : > { %p2508_p3 = por %p368_p2, %p367_p1  ;;  %p44_p4 = scmp.ge.s32.totalorder %s2893_s24, 2 }
  0x16   : > { %p373_p5 = scmp.ne.s32.totalorder %s2330_s30, %s2326_s29  ;;  %p374_p6 = scmp.eq.s32.totalorder %s1761_s22, 3 }
  0x17   : > { %s2865_s27 = scalar_select %p2508_p3, 1, 0 }
  0x18   : > { %p1762_p7 = scmp.ge.s32.totalorder %s2354_s20, 1  ;;  %s2895_s24 = smov (%p44_p4, %s2893_s24), 0 }
  0x19   : > { %2866 = sst [smem:[#allocation24_spill]] %s2895_s24  ;;  %p2517_p8 = por %p374_p6, %p373_p5 }
  0x1a   : > { %p381_p9 = scmp.lt.s32.totalorder %s2354_s20, 5  ;;  %s352_s14 = ssub.s32 %s2350_s19, %s2895_s24 }
  0x1b   : > { %s2867_s28 = scalar_select %p2517_p8, 1, 0 }
  0x1c   : > { %s354_s13 = sor.u32 %s353_s26, %s352_s14  ;;  %p2524_p10 = pnand %p1762_p7, %p381_p9 }
  0x1d   : > { %2868 = sst [smem:[#allocation25_spill]] %s2867_s28  ;;  %p355_p11 = scmp.eq.s32.totalorder %s354_s13, 0 }
  0x1e   : > { %p2528_p12 = scmp.eq.s32.totalorder %s1760_s21, 0  ;;  %p1986_p13 = pneg %p2524_p10 }
  0x1f   : > { %s2535_s22 = scalar_select %p355_p11, %s2334_s15, %s357_s25  }
  0x20   : > { %p2539_p0 = pnand %p2528_p12, %p1986_p13  ;;  %s2356_s14 = smov [#allocation9]  }
  0x21   : > { %2871 = sst [smem:[#allocation26_spill]] %s2535_s22  ;;  %s425_s26 = sshll.u32 %s2356_s14, 4  ;;  %s426_s26 = int_to_ptr.vmem [resolvable:$true] %s425_s26 }
  0x22   : > { %p2148_p1 = pneg %p2539_p0  ;;  %s2157_s13 = scalar_lea.vmem %s426_s26, 16 }
  0x23   : > { %p2158_p2 = scmp.ne.s32.totalorder %s426_s26, %s2157_s13  ;;  %s2164_s21 = scalar_lea.vmem %s426_s26, 32 }
  0x24   : > { %p2165_p6 = scmp.lt.s32.totalorder %s426_s26, %s426_s26  ;;  %p2166_p7 = scmp.lt.s32.totalorder %s2164_s21, %s2157_s13 }
  0x25   : > { %p2160_p4 = pnand %p2158_p2, %p2148_p1 }
  0x26   : > { %p2167_p9 = por %p2166_p7, %p2165_p6 }
  0x27   : > { %p2161_p5 = pneg %p2160_p4 }
  0x29   : > { %p2168_p11 = pnand %p2167_p9, %p2161_p5 }
  0x2b   : > { %2171 = shalt.err (!%p2168_p11)
}
  0x2c   : > { %s2873_s9 = sld [smem:[#allocation28_spill]]  ;;  %s2357_s14 = smov [#allocation6]  }
  0x2d   : > { %s405_s19 = sshll.u32 %s2357_s14, 4  ;;  %s406_s19 = int_to_ptr.vmem [resolvable:$true] %s405_s19 }
  0x2e   : > { %s2183_s22 = scalar_lea.vmem %s406_s19, 256  ;;  %p2191_p8 = scmp.lt.s32.totalorder %s406_s19, %s406_s19 }
  0x2f   : > { %p2184_p13 = scmp.ne.s32.totalorder %s406_s19, %s2183_s22  ;;  %p2192_p6 = scmp.lt.s32.totalorder %s2183_s22, %s2183_s22 }
  0x31   : > { %p2186_p2 = pnand %p2184_p13, %p2148_p1  ;;  %p2193_p5 = por %p2192_p6, %p2191_p8 }
  0x32   : > { %1992 = dma.hbm_to_vmem [thread:$0]  (!%p2539_p0), %s2873_s9, 16, %s426_s26, [#allocation10]  }
  0x33   : > { %p2187_p4 = pneg %p2186_p2 }
  0x35   : > { %p2194_p7 = pnand %p2193_p5, %p2187_p4 }
  0x37   : > { %2197 = shalt.err (!%p2194_p7)
}
  0x38   : > { %s2358_s13 = smov 64   ;;  %s2359_s24 = smov 4  }
  0x39   : > { %s2874_s6 = sld [smem:[#allocation27_spill]]  ;;  %s2360_s25 = smov [#allocation11]  }
  0x3a   : > { %s435_s14 = sshll.u32 %s2360_s25, 4  ;;  %s2361_s9 = smov [#allocation12]   ;;  %s436_s14 = int_to_ptr.vmem [resolvable:$true] %s435_s14 }
  0x3b   : > { %s449_s15 = sshll.u32 %s2361_s9, 4  ;;  %s2209_s29 = scalar_lea.vmem %s436_s14, 256  ;;  %s450_s15 = int_to_ptr.vmem [resolvable:$true] %s449_s15 }
  0x3c   : > { %p2210_p9 = scmp.ne.s32.totalorder %s436_s14, %s2209_s29  ;;  %p2217_p13 = scmp.lt.s32.totalorder %s436_s14, %s436_s14 }
  0x3d   : > { %p2218_p2 = scmp.lt.s32.totalorder %s2209_s29, %s2209_s29 }
  0x3e   : > { %p2212_p8 = pnand %p2210_p9, %p2148_p1 }
  0x3f   : > { %1989 = dma.hbm_to_vmem [thread:$0]  (!%p2539_p0), %s2874_s6, 256, %s406_s19, [#allocation7], %s2358_s13, %s2358_s13, %s2359_s24  }
  0x40   : > { %p2213_p11 = pneg %p2212_p8  ;;  %p2219_p4 = por %p2218_p2, %p2217_p13 }
  0x42   : > { %p2220_p6 = pnand %p2219_p4, %p2213_p11 }
  0x44   : > { %2223 = shalt.err (!%p2220_p6)
}
  0x45   : > { %1995 = dma.hbm_to_vmem [thread:$0]  (!%p2539_p0), %s2842_s10, 256, %s436_s14, [#allocation10], %s2358_s13, %s2358_s13, %s2359_s24  }
  0x46   : > { %s2235_s9 = scalar_lea.vmem %s450_s15, 16  ;;  %s2242_s26 = scalar_lea.vmem %s450_s15, 32 }
  0x47   : > { %p2236_p5 = scmp.ne.s32.totalorder %s450_s15, %s2235_s9  ;;  %p2243_p8 = scmp.lt.s32.totalorder %s450_s15, %s450_s15 }
  0x48   : > { %p2244_p3 = scmp.lt.s32.totalorder %s2242_s26, %s2235_s9 }
  0x49   : > { %p2238_p7 = pnand %p2236_p5, %p2148_p1 }
  0x4a   : > { %p2245_p13 = por %p2244_p3, %p2243_p8 }
  0x4b   : > { %p2239_p9 = pneg %p2238_p7 }
  0x4d   : > { %p2246_p11 = pnand %p2245_p13, %p2239_p9 }
  0x4f   : > { %2249 = shalt.err (!%p2246_p11)
}
  0x50   : > { %1998 = dma.hbm_to_vmem [thread:$0]  (!%p2539_p0), %s2843_s11, 16, %s450_s15, [#allocation13]  }
  0x51   : > { %487 = sbr.rel (%p2524_p10) target bundleno = 2580 (0xa14), region = 76 }
  0x56   : > { %2309 = dma.done.wait (%p2528_p12), [#allocation7], 256  }
  0x57   : > { %2311 = vsyncadd (%p2528_p12), [#allocation7], 4294967040 }
  0x58   : > { %2313 = dma.done.wait (%p2528_p12), [#allocation10], 272  }
  0x59   : > { %2315 = vsyncadd (%p2528_p12), [#allocation10], 4294967024 }
  0x5a   : > { %2317 = dma.done.wait (%p2528_p12), [#allocation13], 16  }
  0x5b   : > { %2319 = vsyncadd (%p2528_p12), [#allocation13], 4294967280  ;;  %s550_s15 = sand.u32 1, %s2330_s30   ;;  %p553_p3 = scmp.lt.s32.totalorder %s2342_s17, 1 }
  0x5c   : > { %s2595_s23 = sshll.u32 %s550_s15, 3  ;;  %p560_p10 = scmp.lt.s32.totalorder %s2338_s16, 1 }
  0x5d   : > { %s554_s28 = scalar_select %p553_p3, %s2342_s17, 1 }
  0x5e   : > { %s561_s13 = scalar_select %p560_p10, %s2338_s16, 1 }
  0x5f   : > { %s1834_s24 = sshll.u32 %s554_s28, 4  ;;  %s1776_s25 = sshll.u32 %s554_s28, 1 }
  0x60   : > { %s557_s22 = scalar_lea.vmem %s2832_s0, %s1834_s24  ;;  %s563_s19 = sadd.s32 %s1776_s25, %s561_s13 }
  0x61   : > { %s1777_s9 = sshll.u32 %s563_s19, 3  ;;  %s552_s6 = scalar_lea.vmem [#allocation14], %s2595_s23 }
  0x62   : > { %s2606_s21 = scalar_lea.vmem %s2833_s1, %s1777_s9  ;;  %p1778_p12 = scmp.ne.s32.totalorder %s2338_s16, 0 }
  0x63   : > { %s2364_s29 = smov (!%p1778_p12), 64   ;;  %s2365_s28 = smov (!%p1778_p12), 96  }
  0x64   : > { %570 = sbr.rel (%p1778_p12) target bundleno = 777 (0x309), region = 96  ;;  %s2366_s13 = smov (!%p1778_p12), 88  }
  0x65   : > { %s2367_s24 = smov (!%p1778_p12), 56   ;;  %s2368_s25 = smov (!%p1778_p12), 80  }
  0x66   : > { %s2369_s14 = smov (!%p1778_p12), 48   ;;  %s2370_s18 = smov (!%p1778_p12), 72  }
  0x67   : > { %s2372_s19 = smov (!%p1778_p12), 112   ;;  %s2373_s9 = smov (!%p1778_p12), 104  }
  0x68   : > { %s2374_s26 = smov (!%p1778_p12), 40  }
  0x69   : > { %v571_v0 = vld [vmem:[%s557_s22] sm:$0xff]  ;;  %vm575_vm0 = vcmask 261120   ;;  %v572_v1 = vld [vmem:[%s557_s22 + $0x8] sm:$0xff]  ;;  %v2362_v15 = vmov 0.0   ;;  %vm2363_vm1 = vmmov 0   ;;  %vm697_vm2 = vcmask 60416  }
  0x6a   : > { %v576_v2 = vsel %vm575_vm0, %v571_v0, 0.0  ;;  %v579_v3 = vsel %vm575_vm0, %v572_v1, 0.0  ;;  %v2100_v14 = vld [vmem:[%s2836_s4 + $0x8] sm:$0xff]   ;;  %1876 = vmatprep.subr.bf16.mxu0 %v2362_v15  ;;  %1880 = vmatprep.mubr.msk.bf16.mxu0 %vm2363_vm1, %v2362_v15  ;;  %v2101_v16 = vld [vmem:[%s2836_s4] sm:$0xff]   ;;  %s2371_s22 = smov 120  }
  0x6b   : > { %577 = vadd.xlane.f32.xlu0 %v576_v2  ;;  %1877 = vmatpush3.bf16.msra.mxu0 %v2100_v14  ;;  %v1779_v25 = vld [vmem:[%s2834_s2] ss:$0 sm:$0xff] }
  0x6c   : > { %1878 = vmatprep.subr.bf16.mxu0 %v2362_v15  ;;  %v1780_v29 = vld [vmem:[%s2835_s3] ss:$0 sm:$0xff] }
  0x6d   : > { %v1781_v34 = vld [vmem:[%s2837_s5] ss:$0 sm:$0xff] }
  0x6f   : > { %580 = vadd.xlane.f32.xlu0 %v579_v3  ;;  %1879 = vmatpush3.bf16.msra.mxu0 %v2101_v16 }
  0xf4   : > { %v578_v4 = vpop.xlane.xlu0 %577 }
  0xf5   : > { %v583_v5 = vmul.f32 0.03125, %v578_v4 }
  0xf7   : > { %v585_v6 = vsub.f32 %v571_v0, %v583_v5 }
  0xf8   : > { %v581_v7 = vpop.xlane.xlu0 %580 }
  0xf9   : > { %v584_v8 = vmul.f32 0.03125, %v581_v7  ;;  %v587_v9 = vmul.f32 %v585_v6, %v585_v6 }
  0xfb   : > { %v586_v10 = vsub.f32 %v572_v1, %v584_v8  ;;  %v589_v11 = vsel %vm575_vm0, %v587_v9, 0.0 }
  0xfc   : > { %590 = vadd.xlane.f32.xlu1 %v589_v11 }
  0xfd   : > { %v588_v12 = vmul.f32 %v586_v10, %v586_v10 }
  0xff   : > { %v592_v13 = vsel %vm575_vm0, %v588_v12, 0.0 }
 0x100   : > { %593 = vadd.xlane.f32.xlu1 %v592_v13 }
 0x185   : > { %v591_v17 = vpop.xlane.xlu1 %590 }
 0x186   : > { %v595_v18 = vmul.f32 0.03125, %v591_v17 }
 0x188   : > { %v597_v19 = vadd.f32 1e-05, %v595_v18 }
 0x189   : > { %v594_v20 = vpop.xlane.xlu1 %593 }
 0x18a   : > { %2102 = vrsqrt.f32 %v597_v19  ;;  %v596_v21 = vmul.f32 0.03125, %v594_v20 }
 0x18c   : > { %v598_v22 = vadd.f32 1e-05, %v596_v21 }
 0x18e   : > { %2104 = vrsqrt.f32 %v598_v22 }
 0x197   : > { %v2103_v23 = vpop.eup %2102 }
 0x198   : > { %v601_v24 = vmul.f32 %v2103_v23, %v585_v6 }
 0x19a   : > { %v609_v28 = vmul.f32 %v1779_v25, %v601_v24 }
 0x19b   : > { %v2105_v26 = vpop.eup %2104 }
 0x19c   : > { %v602_v27 = vmul.f32 %v2105_v26, %v586_v10  ;;  %v617_v31 = vadd.f32 %v1780_v29, %v609_v28 }
 0x19e   : > { %v610_v30 = vmul.f32 %v1779_v25, %v602_v27 }
 0x1a0   : > { %v618_v32 = vadd.f32 %v1780_v29, %v610_v30 }
 0x1a2   : > { %v619_v33 = vpack.c.bf16 %v618_v32, %v617_v31 }
 0x1a4   : > { %1881 = vmatmul.mubr.msk.bf16.vlgmr.msra.gmra.mxu0 %vm575_vm0, %v619_v33 }
 0x264   : > { %v680_v35 = vpop.f32.mrf.mxu0 }
 0x265   : > { %v681_v36 = vadd.f32 %v1781_v34, %v680_v35 }
 0x266   : > { %v1882_v37 = vpop.f32.mrf.mxu0 }
 0x267   : > { %v687_v38 = vmul.f32 0.35355338, %v681_v36  ;;  %v1837_v39 = vpack.c.bf16 %v681_v36, %v681_v36 }
 0x268   : > { %v683_v40 = vpop.f32.mrf.mxu0 }
 0x269   : > { %v1835_v41 = vpack.c.bf16 %v687_v38, %v687_v38  ;;  %v684_v42 = vadd.f32 %v1781_v34, %v683_v40  ;;  %714 = vrot.lane.b32.xlu1 %v1837_v39, %s2364_s29  ;;  %706 = vrot.lane.b32.xlu0 %v1837_v39, %s2365_s28 }
 0x26a   : > { %v1883_v43 = vpop.f32.mrf.mxu0 }
 0x26b   : > { %698 = vst.msk [vmem:[#allocation2] sm:$0xf] %vm697_vm2, %v1835_v41  ;;  %v688_v44 = vmul.f32 0.35355338, %v684_v42  ;;  %v1838_v45 = vpack.c.bf16 %v684_v42, %v684_v42 }
 0x26d   : > { %v1836_v46 = vpack.c.bf16 %v688_v44, %v688_v44  ;;  %731 = vrot.lane.b32.xlu0 %v1837_v39, %s2366_s13  ;;  %708 = vrot.lane.b32.xlu1 %v1838_v45, %s2365_s28 }
 0x26f   : > { %699 = vst.msk [vmem:[#allocation2 + $0x4] sm:$0xf] %vm697_vm2, %v1836_v46 }
 0x271   : > { %740 = vrot.lane.b32.xlu0 %v1837_v39, %s2367_s24  ;;  %716 = vrot.lane.b32.xlu1 %v1838_v45, %s2364_s29 }
 0x275   : > { %758 = vrot.lane.b32.xlu0 %v1837_v39, %s2368_s25  ;;  %733 = vrot.lane.b32.xlu1 %v1838_v45, %s2366_s13 }
 0x279   : > { %767 = vrot.lane.b32.xlu0 %v1837_v39, %s2369_s14  ;;  %742 = vrot.lane.b32.xlu1 %v1838_v45, %s2367_s24 }
 0x27d   : > { %785 = vrot.lane.b32.xlu0 %v1837_v39, %s2370_s18  ;;  %760 = vrot.lane.b32.xlu1 %v1838_v45, %s2368_s25 }
 0x281   : > { %722 = vrot.lane.b32.xlu0 %v1835_v41, %s2371_s22  ;;  %769 = vrot.lane.b32.xlu1 %v1838_v45, %s2369_s14 }
 0x285   : > { %749 = vrot.lane.b32.xlu0 %v1835_v41, %s2372_s19  ;;  %787 = vrot.lane.b32.xlu1 %v1838_v45, %s2370_s18 }
 0x289   : > { %776 = vrot.lane.b32.xlu0 %v1835_v41, %s2373_s9  ;;  %724 = vrot.lane.b32.xlu1 %v1836_v46, %s2371_s22 }
 0x28d   : > { %794 = vrot.lane.b32.xlu0 %v1837_v39, %s2374_s26  ;;  %751 = vrot.lane.b32.xlu1 %v1836_v46, %s2372_s19 }
 0x291   : > { %778 = vrot.lane.b32.xlu1 %v1836_v46, %s2373_s9 }
 0x295   : > { %796 = vrot.lane.b32.xlu1 %v1838_v45, %s2374_s26 }
 0x2db   : > { %v715_v47 = vpop.permute.xlu1 %714  ;;  %v707_v48 = vpop.permute.xlu0 %706 }
 0x2dc   : > { %720 = vst.msk [vmem:[#allocation4] sm:$0xf] %vm697_vm2, %v715_v47  ;;  %712 = vst.msk [vmem:[#allocation3] sm:$0xf] %vm697_vm2, %v707_v48 }
 0x2df   : > { %v732_v49 = vpop.permute.xlu0 %731  ;;  %v709_v50 = vpop.permute.xlu1 %708 }
 0x2e0   : > { %738 = vst.msk [vmem:[#allocation3 + $0x8] sm:$0xf] %vm697_vm2, %v732_v49  ;;  %713 = vst.msk [vmem:[#allocation3 + $0x4] sm:$0xf] %vm697_vm2, %v709_v50 }
 0x2e3   : > { %v741_v51 = vpop.permute.xlu0 %740  ;;  %v717_v52 = vpop.permute.xlu1 %716 }
 0x2e4   : > { %747 = vst.msk [vmem:[#allocation4 + $0x8] sm:$0xf] %vm697_vm2, %v741_v51  ;;  %721 = vst.msk [vmem:[#allocation4 + $0x4] sm:$0xf] %vm697_vm2, %v717_v52 }
 0x2e7   : > { %v759_v53 = vpop.permute.xlu0 %758  ;;  %v734_v54 = vpop.permute.xlu1 %733 }
 0x2e8   : > { %765 = vst.msk [vmem:[#allocation3 + $0x10] sm:$0xf] %vm697_vm2, %v759_v53  ;;  %739 = vst.msk [vmem:[#allocation3 + $0xc] sm:$0xf] %vm697_vm2, %v734_v54 }
 0x2eb   : > { %v768_v55 = vpop.permute.xlu0 %767  ;;  %v743_v56 = vpop.permute.xlu1 %742 }
 0x2ec   : > { %774 = vst.msk [vmem:[#allocation4 + $0x10] sm:$0xf] %vm697_vm2, %v768_v55  ;;  %748 = vst.msk [vmem:[#allocation4 + $0xc] sm:$0xf] %vm697_vm2, %v743_v56 }
 0x2ef   : > { %v786_v57 = vpop.permute.xlu0 %785  ;;  %v761_v58 = vpop.permute.xlu1 %760 }
 0x2f0   : > { %792 = vst.msk [vmem:[#allocation3 + $0x18] sm:$0xf] %vm697_vm2, %v786_v57  ;;  %766 = vst.msk [vmem:[#allocation3 + $0x14] sm:$0xf] %vm697_vm2, %v761_v58 }
 0x2f3   : > { %v723_v59 = vpop.permute.xlu0 %722  ;;  %v770_v60 = vpop.permute.xlu1 %769 }
 0x2f4   : > { %729 = vst.msk [vmem:[#allocation2 + $0x8] sm:$0xf] %vm697_vm2, %v723_v59  ;;  %775 = vst.msk [vmem:[#allocation4 + $0x14] sm:$0xf] %vm697_vm2, %v770_v60 }
 0x2f7   : > { %v750_v61 = vpop.permute.xlu0 %749  ;;  %v788_v62 = vpop.permute.xlu1 %787 }
 0x2f8   : > { %756 = vst.msk [vmem:[#allocation2 + $0x10] sm:$0xf] %vm697_vm2, %v750_v61  ;;  %793 = vst.msk [vmem:[#allocation3 + $0x1c] sm:$0xf] %vm697_vm2, %v788_v62 }
 0x2fb   : > { %v777_v63 = vpop.permute.xlu0 %776  ;;  %v725_v0 = vpop.permute.xlu1 %724 }
 0x2fc   : > { %783 = vst.msk [vmem:[#allocation2 + $0x18] sm:$0xf] %vm697_vm2, %v777_v63  ;;  %730 = vst.msk [vmem:[#allocation2 + $0xc] sm:$0xf] %vm697_vm2, %v725_v0 }
 0x2ff   : > { %v795_v1 = vpop.permute.xlu0 %794  ;;  %v752_v2 = vpop.permute.xlu1 %751 }
 0x300   : > { %801 = vst.msk [vmem:[#allocation4 + $0x18] sm:$0xf] %vm697_vm2, %v795_v1  ;;  %757 = vst.msk [vmem:[#allocation2 + $0x14] sm:$0xf] %vm697_vm2, %v752_v2 }
 0x303   : > { %v779_v3 = vpop.permute.xlu1 %778 }
 0x304   : > { %784 = vst.msk [vmem:[#allocation2 + $0x1c] sm:$0xf] %vm697_vm2, %v779_v3 }
 0x307   : > { %v797_v4 = vpop.permute.xlu1 %796 }
 0x308   : > { %802 = vst.msk [vmem:[#allocation4 + $0x1c] sm:$0xf] %vm697_vm2, %v797_v4 }
 0x309 PF: > { %v2106_v5 = vld [vmem:[#allocation3] sm:$0xff]   ;;  %v2375_v6 = vmov 0.0   ;;  %vm825_vm3 = vcmask 64512   ;;  %s1789_s29 = sshll.u32 %s2338_s16, 3  ;;  %v2107_v7 = vld [vmem:[#allocation3 + $0x8] sm:$0xff]   ;;  %vm2376_vm4 = vmmov 0   ;;  %v1025_v18 = vlaneseq }
 0x30a   : > { %1884 = vmatprep.subr.bf16.mxu1 %v2375_v6  ;;  %1908 = vmatprep.subr.bf16.mxu0 %v2375_v6  ;;  %v830_v8 = vsel %vm825_vm3, %v2106_v5, 0  ;;  %s804_s28 = sshra.s32 %s1789_s29, 3  ;;  %v2108_v9 = vld [vmem:[#allocation3 + $0x10] sm:$0xff]   ;;  %v881_v11 = vsel %vm825_vm3, %v2107_v7, 0  ;;  %v2109_v14 = vld [vmem:[#allocation3 + $0x18] sm:$0xff]   ;;  %v1027_v20 = vstv %s1789_s29  ;;  %vm1038_vm6 = vcmask 130048  }
 0x30b   : > { %1886 = vmatprep.mubr.msk.bf16.mxu1 %vm2376_vm4, %v2375_v6  ;;  %1910 = vmatprep.mubr.msk.bf16.mxu0 %vm2376_vm4, %v2375_v6  ;;  %s1790_s13 = sshll.u32 %s804_s28, 2  ;;  %v932_v12 = vsel %vm825_vm3, %v2108_v9, 0  ;;  %v983_v16 = vsel %vm825_vm3, %v2109_v14, 0  ;;  %v1026_v19 = vshrl.u32 %v1025_v18, 7  ;;  %v1030_v22 = vand.u32 127, %v1025_v18  ;;  %v2110_v1 = vld [vmem:[#allocation4] sm:$0xff]  }
 0x30c   : > { %1885 = vmatpush3.bf16.xpose.msra.mxu1 %v830_v8  ;;  %s807_s24 = scalar_lea.vmem [#allocation2], %s1790_s13  ;;  %1909 = vmatpush3.bf16.msra.mxu0 %v2110_v1  ;;  %v2111_v4 = vld [vmem:[#allocation4 + $0x8] sm:$0xff]   ;;  %vm1292_vm7 = vcmask 60416   ;;  %s2377_s25 = smov 8   ;;  %vm1301_vm8 = vcmask 126016   ;;  %vm1310_vm9 = vcmask 191616  }
 0x30d   : > { %1890 = vmatprep.subr.bf16.mxu1 %v2375_v6  ;;  %v808_v10 = vld [vmem:[%s807_s24] sm:$0xf]  ;;  %v809_v13 = vld [vmem:[%s807_s24 + $0x8] sm:$0xf]  ;;  %v810_v15 = vld [vmem:[%s807_s24 + $0x10] sm:$0xf]  ;;  %v1028_v21 = vadd.s32 %v1027_v20, %v1026_v19  ;;  %1920 = vmatprep.subr.bf16.mxu0 %v2375_v6 }
 0x30e   : > { %v811_v17 = vld [vmem:[%s807_s24 + $0x18] sm:$0xf]  ;;  %s2378_s14 = smov 16   ;;  %s2379_s18 = smov 24   ;;  %vm1319_vm10 = vcmask 257216   ;;  %vm1346_vm11 = vcmask 261120  }
 0x30f   : > { %vm1031_vm5 = vcmp.le.s32.totalorder %v1030_v22, %v1028_v21  ;;  %v2117_v1 = vld [vmem:[#allocation11] sm:$0xff]   ;;  %s1830_s24 = sshll.u32 %s2342_s17, 1  ;;  %s2875_s22 = sld [smem:[#allocation29_spill]] }
 0x310   : > { %s2876_s29 = sld [smem:[#allocation30_spill]]  ;;  %p2878_p1 = scmp.ne.s32.totalorder %s2865_s27, 0 }
 0x313   : > { %1887 = vmatmul.mubr.msk.bf16.vlgmr.msra.gmra.mxu1 %vm825_vm3, %v808_v10 }
 0x314   : > { %1891 = vmatpush3.bf16.xpose.msra.mxu1 %v881_v11  ;;  %1892 = vmatprep.mubr.msk.bf16.mxu1 %vm2376_vm4, %v2375_v6  ;;  %v2112_v11 = vld [vmem:[#allocation4 + $0x10] sm:$0xff]  }
 0x315   : > { %1896 = vmatprep.subr.bf16.mxu1 %v2375_v6 }
 0x316   : > { %s2877_s28 = smov %s2876_s29 }
 0x31b   : > { %1893 = vmatmul.mubr.msk.bf16.vlgmr.msra.gmra.mxu1 %vm825_vm3, %v809_v13 }
 0x31c   : > { %1897 = vmatpush3.bf16.xpose.msra.mxu1 %v932_v12  ;;  %1898 = vmatprep.mubr.msk.bf16.mxu1 %vm2376_vm4, %v2375_v6 }
 0x31d   : > { %1902 = vmatprep.subr.bf16.mxu1 %v2375_v6 }
 0x323   : > { %1899 = vmatmul.mubr.msk.bf16.vlgmr.msra.gmra.mxu1 %vm825_vm3, %v810_v15 }
 0x324   : > { %1903 = vmatpush3.bf16.xpose.msra.mxu1 %v983_v16  ;;  %1904 = vmatprep.mubr.msk.bf16.mxu1 %vm2376_vm4, %v2375_v6  ;;  %v2113_v16 = vld [vmem:[#allocation4 + $0x18] sm:$0xff]  }
 0x325   : > { %1914 = vmatprep.subr.bf16.mxu1 %v2375_v6 }
 0x32b   : > { %1905 = vmatmul.mubr.msk.bf16.vlgmr.msra.gmra.mxu1 %vm825_vm3, %v811_v17 }
 0x32c   : > { %1916 = vmatprep.mubr.msk.bf16.mxu1 %vm2376_vm4, %v2375_v6  ;;  %1915 = vmatpush3.bf16.msra.mxu1 %v2111_v4 }
 0x32d   : > { %1926 = vmatprep.subr.bf16.mxu1 %v2375_v6 }
 0x3d3   : > { %v866_v23 = vpop.f32.mrf.mxu1 }
 0x3d4   : > { %v1034_v24 = vsel %vm1031_vm5, %v866_v23, -inf }
 0x3d5   : > { %v1888_v25 = vpop.f32.mrf.mxu1  ;;  %v1039_v26 = vsel %vm1038_vm6, %v1034_v24, -inf }
 0x3d6   : > { %1040 = vmax.xlane.f32.xlu0 %v1039_v26 }
 0x3d7   : > { %v869_v27 = vpop.f32.mrf.mxu1 }
 0x3d9   : > { %v1889_v28 = vpop.f32.mrf.mxu1 }
 0x3db   : > { %v917_v29 = vpop.f32.mrf.mxu1 }
 0x3dc   : > { %v1035_v30 = vsel %vm1031_vm5, %v917_v29, -inf }
 0x3dd   : > { %v1894_v31 = vpop.f32.mrf.mxu1  ;;  %v1042_v32 = vsel %vm1038_vm6, %v1035_v30, -inf }
 0x3de   : > { %1043 = vmax.xlane.f32.xlu0 %v1042_v32 }
 0x3df   : > { %v920_v33 = vpop.f32.mrf.mxu1 }
 0x3e0   : > { %v2114_v33 = vld [vmem:[#allocation6 + $0x8] sm:$0xff]  }
 0x3e1   : > { %v1895_v34 = vpop.f32.mrf.mxu1 }
 0x3e3   : > { %v968_v35 = vpop.f32.mrf.mxu1 }
 0x3e4   : > { %v1036_v36 = vsel %vm1031_vm5, %v968_v35, -inf  ;;  %v2115_v35 = vld [vmem:[#allocation6] sm:$0xff]  }
 0x3e5   : > { %v1900_v37 = vpop.f32.mrf.mxu1  ;;  %v1045_v38 = vsel %vm1038_vm6, %v1036_v36, -inf }
 0x3e6   : > { %1046 = vmax.xlane.f32.xlu1 %v1045_v38 }
 0x3e7   : > { %v971_v39 = vpop.f32.mrf.mxu1 }
 0x3e9   : > { %v1901_v40 = vpop.f32.mrf.mxu1 }
 0x3eb   : > { %v1019_v41 = vpop.f32.mrf.mxu1 }
 0x3ec   : > { %v1037_v42 = vsel %vm1031_vm5, %v1019_v41, -inf }
 0x3ed   : > { %v1906_v43 = vpop.f32.mrf.mxu1  ;;  %v1048_v44 = vsel %vm1038_vm6, %v1037_v42, -inf }
 0x3ee   : > { %1049 = vmax.xlane.f32.xlu1 %v1048_v44 }
 0x3ef   : > { %v1022_v45 = vpop.f32.mrf.mxu1 }
 0x3f1   : > { %v1907_v46 = vpop.f32.mrf.mxu1 }
 0x45f   : > { %v1041_v47 = vpop.xlane.xlu0 %1040 }
 0x460   : > { %v1051_v48 = vsub.f32 %v1034_v24, %v1041_v47 }
 0x462   : > { %v1055_v49 = vmul.f32 1.442695, %v1051_v48 }
 0x464   : > { %2126 = vpow2.f32 %v1055_v49 }
 0x467   : > { %v1044_v50 = vpop.xlane.xlu0 %1043 }
 0x468   : > { %v1052_v51 = vsub.f32 %v1035_v30, %v1044_v50  ;;  %v1810_v50 = vld [vmem:[%s2839_s7] ss:$0 sm:$0xff] }
 0x46a   : > { %v1057_v52 = vmul.f32 1.442695, %v1052_v51  ;;  %v1321_v51 = vld [vmem:[%s2606_s21] sm:$0xff]  ;;  %s1627_s21 = sshll.u32 %s552_s6, 4  ;;  %s2777_s21 = int_to_ptr.vmem [resolvable:$true] %s1627_s21 }
 0x46b   : > { %s2250_s17 = scalar_lea.vmem %s2777_s21, 128 }
 0x46c   : > { %2128 = vpow2.f32 %v1057_v52  ;;  %p2251_p0 = scmp.ne.s32.totalorder %s2777_s21, %s2250_s17 }
 0x46e   : > { %p2252_p2 = pnand %p2251_p0, %p2878_p1 }
 0x46f   : > { %v1047_v53 = vpop.xlane.xlu1 %1046 }
 0x470   : > { %v1053_v54 = vsub.f32 %v1036_v36, %v1047_v53  ;;  %p2253_p4 = pneg %p2252_p2 }
 0x471   : > { %v2127_v55 = vpop.eup %2126 }
 0x472   : > { %v1059_v56 = vmul.f32 1.442695, %v1053_v54  ;;  %v1063_v57 = vsel %vm1038_vm6, %v2127_v55, 0.0 }
 0x473   : > { %1064 = vadd.xlane.f32.xlu0 %v1063_v57 }
 0x474   : > { %2130 = vpow2.f32 %v1059_v56 }
 0x477   : > { %v1050_v58 = vpop.xlane.xlu1 %1049 }
 0x478   : > { %v1054_v59 = vsub.f32 %v1037_v42, %v1050_v58 }
 0x479   : > { %v2129_v60 = vpop.eup %2128 }
 0x47a   : > { %v1061_v61 = vmul.f32 1.442695, %v1054_v59  ;;  %v1066_v62 = vsel %vm1038_vm6, %v2129_v60, 0.0 }
 0x47b   : > { %1067 = vadd.xlane.f32.xlu1 %v1066_v62 }
 0x47c   : > { %2132 = vpow2.f32 %v1061_v61 }
 0x481   : > { %v2131_v63 = vpop.eup %2130 }
 0x482   : > { %v1069_v0 = vsel %vm1038_vm6, %v2131_v63, 0.0 }
 0x483   : > { %1070 = vadd.xlane.f32.xlu0 %v1069_v0  ;;  %v2116_v0 = vld [vmem:[#allocation11 + $0x8] sm:$0xff]  }
 0x489   : > { %v2133_v2 = vpop.eup %2132 }
 0x48a   : > { %v1072_v3 = vsel %vm1038_vm6, %v2133_v2, 0.0 }
 0x48b   : > { %1073 = vadd.xlane.f32.xlu1 %v1072_v3 }
 0x4fc   : > { %v1065_v5 = vpop.xlane.xlu0 %1064 }
 0x4fd   : > { %2134 = vrcp.f32 %v1065_v5 }
 0x504   : > { %v1068_v7 = vpop.xlane.xlu1 %1067 }
 0x505   : > { %2136 = vrcp.f32 %v1068_v7  ;;  %v1814_v7 = vld [vmem:[%s2840_s8] ss:$0 sm:$0xff] }
 0x50a   : > { %v2135_v8 = vpop.eup %2134 }
 0x50b   : > { %v1079_v9 = vmul.f32 %v2135_v8, %v2127_v55 }
 0x50c   : > { %v1071_v10 = vpop.xlane.xlu0 %1070 }
 0x50d   : > { %2138 = vrcp.f32 %v1071_v10  ;;  %v1083_v12 = vpack.c.bf16 %v1079_v9, %v1079_v9  ;;  %v1815_v9 = vld [vmem:[#allocation9] ss:$0 sm:$0xff] }
 0x50f   : > { %1911 = vmatmul.mubr.msk.bf16.vlgmr.msra.gmra.mxu0 %vm1038_vm6, %v1083_v12 }
 0x510   : > { %1921 = vmatpush3.bf16.msra.mxu0 %v2112_v11  ;;  %1922 = vmatprep.mubr.msk.bf16.mxu0 %vm2376_vm4, %v2375_v6 }
 0x511   : > { %1932 = vmatprep.subr.bf16.mxu0 %v2375_v6 }
 0x512   : > { %v2137_v13 = vpop.eup %2136 }
 0x513   : > { %v1080_v14 = vmul.f32 %v2137_v13, %v2129_v60  ;;  %v2118_v13 = vld [vmem:[%s2844_s12 + $0x38] sm:$0xff]  }
 0x514   : > { %v1074_v15 = vpop.xlane.xlu1 %1073 }
 0x515   : > { %2140 = vrcp.f32 %v1074_v15  ;;  %v1084_v17 = vpack.c.bf16 %v1080_v14, %v1080_v14  ;;  %v2119_v14 = vld [vmem:[%s2844_s12 + $0x30] sm:$0xff]   ;;  %v2120_v15 = vld [vmem:[%s2844_s12 + $0x28] sm:$0xff]  }
 0x517   : > { %1917 = vmatmul.mubr.msk.bf16.vlgmr.msra.gmra.mxu1 %vm1038_vm6, %v1084_v17  ;;  %v2122_v17 = vld [vmem:[%s2844_s12 + $0x18] sm:$0xff]  }
 0x518   : > { %1927 = vmatpush3.bf16.msra.mxu1 %v2113_v16  ;;  %1928 = vmatprep.mubr.msk.bf16.mxu1 %vm2376_vm4, %v2375_v6  ;;  %v2121_v16 = vld [vmem:[%s2844_s12 + $0x20] sm:$0xff]  }
 0x519   : > { %1940 = vmatprep.subr.bf16.mxu1 %v2375_v6 }
 0x51a   : > { %v2139_v18 = vpop.eup %2138 }
 0x51b   : > { %v1081_v19 = vmul.f32 %v2139_v18, %v2131_v63  ;;  %v2123_v18 = vld [vmem:[%s2844_s12 + $0x10] sm:$0xff]  }
 0x51d   : > { %v1085_v20 = vpack.c.bf16 %v1081_v19, %v1081_v19  ;;  %v2124_v19 = vld [vmem:[%s2844_s12 + $0x8] sm:$0xff]  }
 0x51f   : > { %1923 = vmatmul.mubr.msk.bf16.vlgmr.msra.gmra.mxu0 %vm1038_vm6, %v1085_v20  ;;  %v2125_v20 = vld [vmem:[%s2844_s12] sm:$0xff]  }
 0x520   : > { %1936 = vmatprep.mubr.msk.bf16.mxu0 %vm2376_vm4, %v2375_v6  ;;  %1933 = vmatpush3.bf16.msra.mxu0 %v2114_v33 }
 0x521   : > { %1934 = vmatprep.subr.bf16.mxu0 %v2375_v6 }
 0x522   : > { %v2141_v21 = vpop.eup %2140 }
 0x523   : > { %v1082_v22 = vmul.f32 %v2141_v21, %v2133_v2  ;;  %v1816_v21 = vld [vmem:[#allocation12] ss:$0 sm:$0xff] }
 0x524   : > { %1935 = vmatpush3.bf16.msra.mxu0 %v2115_v35 }
 0x525   : > { %v1086_v23 = vpack.c.bf16 %v1082_v22, %v1082_v22  ;;  %1948 = vmatprep.subr.bf16.mxu0 %v2375_v6 }
 0x527   : > { %1929 = vmatmul.mubr.msk.bf16.vlgmr.msra.gmra.mxu1 %vm1038_vm6, %v1086_v23 }
 0x528   : > { %1944 = vmatprep.mubr.msk.bf16.mxu1 %vm2376_vm4, %v2375_v6  ;;  %1941 = vmatpush3.bf16.msra.mxu1 %v2116_v0 }
 0x529   : > { %1942 = vmatprep.subr.bf16.mxu1 %v2375_v6 }
 0x52c   : > { %1943 = vmatpush3.bf16.msra.mxu1 %v2117_v1 }
 0x5cf   : > { %v1138_v24 = vpop.f32.mrf.mxu0 }
 0x5d0   : > { %v1291_v25 = vpack.c.bf16 %v1138_v24, %v1138_v24 }
 0x5d1   : > { %v1912_v26 = vpop.f32.mrf.mxu0 }
 0x5d2   : > { %1293 = vst.msk [vmem:[#allocation5] sm:$0xf] %vm1292_vm7, %v1291_v25 }
 0x5d3   : > { %v1141_v27 = vpop.f32.mrf.mxu0 }
 0x5d5   : > { %v1913_v28 = vpop.f32.mrf.mxu0 }
 0x5d7   : > { %v1187_v29 = vpop.f32.mrf.mxu1 }
 0x5d8   : > { %v1839_v30 = vpack.c.bf16 %v1187_v29, %v1187_v29 }
 0x5d9   : > { %v1918_v31 = vpop.f32.mrf.mxu1 }
 0x5da   : > { %1298 = vrot.lane.b32.xlu0 %v1839_v30, %s2377_s25  ;;  %s1623_s25 = sadd.s32 %s2338_s16, %s1830_s24  ;;  %s1612_s16 = scalar_lea.sflag [#allocation8], %s550_s15 }
 0x5db   : > { %v1190_v32 = vpop.f32.mrf.mxu1  ;;  %s1831_s19 = sshll.u32 %s1623_s25, 7  ;;  %s2380_s24 = smov [#allocation14]  }
 0x5dc   : > { %s2775_s13 = scalar_lea.hbm %s2876_s29, %s1831_s19  ;;  %s2254_s25 = sshll.u32 %s2380_s24, 4  ;;  %s2255_s25 = int_to_ptr.vmem [resolvable:$false] %s2254_s25 }
 0x5dd   : > { %v1919_v34 = vpop.f32.mrf.mxu1  ;;  %p2257_p6 = scmp.lt.s32.totalorder %s2777_s21, %s2255_s25 }
 0x5df   : > { %v1236_v36 = vpop.f32.mrf.mxu0 }
 0x5e0   : > { %v1840_v37 = vpack.c.bf16 %v1236_v36, %v1236_v36  ;;  %v1820_v36 = vld [vmem:[%s2875_s22] ss:$0 sm:$0xff] }
 0x5e1   : > { %v1924_v38 = vpop.f32.mrf.mxu0 }
 0x5e2   : > { %1307 = vrot.lane.b32.xlu1 %v1840_v37, %s2378_s14  ;;  %s2256_s14 = scalar_lea.vmem %s2255_s25, 256 }
 0x5e3   : > { %v1239_v39 = vpop.f32.mrf.mxu0  ;;  %p2258_p5 = scmp.lt.s32.totalorder %s2256_s14, %s2250_s17 }
 0x5e5   : > { %v1925_v40 = vpop.f32.mrf.mxu0  ;;  %p2259_p7 = por %p2258_p5, %p2257_p6 }
 0x5e7   : > { %v1285_v41 = vpop.f32.mrf.mxu1  ;;  %p2260_p9 = pnand %p2259_p7, %p2253_p4 }
 0x5e8   : > { %v1841_v42 = vpack.c.bf16 %v1285_v41, %v1285_v41 }
 0x5e9   : > { %v1930_v43 = vpop.f32.mrf.mxu1 }
 0x5ea   : > { %1316 = vrot.lane.b32.xlu1 %v1841_v42, %s2379_s18 }
 0x5eb   : > { %v1288_v44 = vpop.f32.mrf.mxu1 }
 0x5ed   : > { %v1931_v45 = vpop.f32.mrf.mxu1 }
 0x64c   : > { %v1299_v46 = vpop.permute.xlu0 %1298 }
 0x64d   : > { %1302 = vst.msk [vmem:[#allocation5] sm:$0xf] %vm1301_vm8, %v1299_v46 }
 0x654   : > { %v1308_v47 = vpop.permute.xlu1 %1307 }
 0x655   : > { %1311 = vst.msk [vmem:[#allocation5] sm:$0xf] %vm1310_vm9, %v1308_v47 }
 0x65c   : > { %v1317_v48 = vpop.permute.xlu1 %1316 }
 0x65d   : > { %1320 = vst.msk [vmem:[#allocation5] sm:$0xf] %vm1319_vm10, %v1317_v48 }
 0x664   : > { %v1322_v49 = vld [vmem:[#allocation5] sm:$0xf] }
 0x665   : > { %1937 = vmatmul.mubr.msk.bf16.vlgmr.msra.gmra.mxu0 %vm1346_vm11, %v1322_v49 }
 0x666   : > { %1964 = vmatprep.mubr.msk.bf16.mxu0 %vm2376_vm4, %v2375_v6  ;;  %1949 = vmatpush3.bf16.msra.mxu0 %v2118_v13 }
 0x667   : > { %1950 = vmatprep.subr.bf16.mxu0 %v2375_v6 }
 0x66a   : > { %1951 = vmatpush3.bf16.msra.mxu0 %v2119_v14 }
 0x66b   : > { %1952 = vmatprep.subr.bf16.mxu0 %v2375_v6 }
 0x66e   : > { %1953 = vmatpush3.bf16.msra.mxu0 %v2120_v15 }
 0x66f   : > { %1954 = vmatprep.subr.bf16.mxu0 %v2375_v6 }
 0x672   : > { %1955 = vmatpush3.bf16.msra.mxu0 %v2121_v16 }
 0x673   : > { %1956 = vmatprep.subr.bf16.mxu0 %v2375_v6 }
 0x676   : > { %1957 = vmatpush3.bf16.msra.mxu0 %v2122_v17 }
 0x677   : > { %1958 = vmatprep.subr.bf16.mxu0 %v2375_v6 }
 0x67a   : > { %1959 = vmatpush3.bf16.msra.mxu0 %v2123_v18 }
 0x67b   : > { %1960 = vmatprep.subr.bf16.mxu0 %v2375_v6 }
 0x67e   : > { %1961 = vmatpush3.bf16.msra.mxu0 %v2124_v19 }
 0x67f   : > { %1962 = vmatprep.subr.bf16.mxu0 %v2375_v6 }
 0x682   : > { %1963 = vmatpush3.bf16.msra.mxu0 %v2125_v20 }
 0x725   : > { %v1384_v52 = vpop.f32.mrf.mxu0 }
 0x726   : > { %v1385_v53 = vadd.f32 %v1810_v50, %v1384_v52 }
 0x727   : > { %v1938_v54 = vpop.f32.mrf.mxu0 }
 0x728   : > { %v2722_v55 = vadd.f32 %v1385_v53, %v1321_v51 }
 0x729   : > { %v1387_v56 = vpop.f32.mrf.mxu0 }
 0x72a   : > { %v1393_v57 = vsel %vm1346_vm11, %v2722_v55, 0.0 }
 0x72b   : > { %1394 = vadd.xlane.f32.xlu1 %v1393_v57  ;;  %v1939_v58 = vpop.f32.mrf.mxu0 }
 0x7b4   : > { %v1395_v59 = vpop.xlane.xlu1 %1394 }
 0x7b5   : > { %v1397_v60 = vmul.f32 0.03125, %v1395_v59 }
 0x7b7   : > { %v1398_v61 = vsub.f32 %v2722_v55, %v1397_v60 }
 0x7b9   : > { %v1399_v62 = vmul.f32 %v1398_v61, %v1398_v61 }
 0x7bb   : > { %v1400_v63 = vsel %vm1346_vm11, %v1399_v62, 0.0 }
 0x7bc   : > { %1401 = vadd.xlane.f32.xlu0 %v1400_v63 }
 0x845   : > { %v1402_v2 = vpop.xlane.xlu0 %1401 }
 0x846   : > { %v1403_v3 = vmul.f32 0.03125, %v1402_v2 }
 0x848   : > { %v1404_v4 = vadd.f32 1e-05, %v1403_v3 }
 0x84a   : > { %2142 = vrsqrt.f32 %v1404_v4 }
 0x857   : > { %v2143_v5 = vpop.eup %2142 }
 0x858   : > { %v1406_v8 = vmul.f32 %v2143_v5, %v1398_v61 }
 0x85a   : > { %v1413_v10 = vmul.f32 %v1814_v7, %v1406_v8 }
 0x85c   : > { %v1420_v11 = vadd.f32 %v1815_v9, %v1413_v10 }
 0x85e   : > { %v1421_v12 = vpack.c.bf16 %v1420_v11, %v1420_v11 }
 0x860   : > { %1945 = vmatmul.mubr.msk.bf16.vlgmr.msra.gmra.mxu1 %vm1346_vm11, %v1421_v12 }
 0x920   : > { %v1482_v22 = vpop.f32.mrf.mxu1 }
 0x921   : > { %v1483_v23 = vadd.f32 %v1816_v21, %v1482_v22 }
 0x922   : > { %v1946_v24 = vpop.f32.mrf.mxu1 }
 0x923   : > { %v1489_v25 = vmul.f32 0.044715, %v1483_v23  ;;  %v1488_v33 = vmul.f32 0.5, %v1483_v23 }
 0x924   : > { %v1485_v26 = vpop.f32.mrf.mxu1 }
 0x925   : > { %v1490_v27 = vmul.f32 %v1489_v25, %v1483_v23 }
 0x926   : > { %v1947_v28 = vpop.f32.mrf.mxu1 }
 0x927   : > { %v1491_v29 = vmul.f32 %v1490_v27, %v1483_v23 }
 0x929   : > { %v1492_v30 = vadd.f32 %v1491_v29, %v1483_v23 }
 0x92b   : > { %v1493_v31 = vmul.f32 0.7978846, %v1492_v30 }
 0x92d   : > { %2144 = vtanh.f32 %v1493_v31 }
 0x93a   : > { %v2145_v32 = vpop.eup %2144 }
 0x93b   : > { %v1495_v34 = vadd.f32 1.0, %v2145_v32 }
 0x93d   : > { %v1496_v6 = vmul.f32 %v1495_v34, %v1488_v33 }
 0x93f   : > { %v1497_v35 = vpack.c.bf16 %v1496_v6, %v1496_v6 }
 0x941   : > { %1965 = vmatmul.mubr.bf16.vlgmr.msra.gmra.mxu0 %v1497_v35 }
 0xa01   : > { %v1603_v37 = vpop.f32.mrf.mxu0 }
 0xa02   : > { %v1604_v38 = vadd.f32 %v1820_v36, %v1603_v37 }
 0xa03   : > { %v1966_v39 = vpop.f32.mrf.mxu0 }
 0xa04   : > { %v1609_v40 = vadd.f32 %v1604_v38, %v2722_v55 }
 0xa05   : > { %v1606_v41 = vpop.f32.mrf.mxu0 }
 0xa06   : > { %1610 = vst.msk [vmem:[%s552_s6] sm:$0xff] %vm1346_vm11, %v1609_v40 }
 0xa07   : > { %v1967_v42 = vpop.f32.mrf.mxu0 }
 0xa08   : > { %2263 = shalt.err (!%p2260_p9)
}
 0xa09   : > { %s2264_s6 = scalar_lea.hbm %s2775_s13, 128  ;;  %s2268_s18 = scalar_lea.hbm %s2877_s28, 512 }
 0xa0a   : > { %p2265_p8 = scmp.ne.s32.totalorder %s2775_s13, %s2264_s6  ;;  %p2269_p3 = scmp.lt.s32.totalorder %s2775_s13, %s2877_s28 }
 0xa0b   : > { %p2270_p10 = scmp.lt.s32.totalorder %s2268_s18, %s2264_s6 }
 0xa0c   : > { %p2266_p13 = pnand %p2265_p8, %p2878_p1 }
 0xa0d   : > { %p2271_p12 = por %p2270_p10, %p2269_p3 }
 0xa0e   : > { %p2267_p11 = pneg %p2266_p13 }
 0xa10   : > { %p2272_p0 = pnand %p2271_p12, %p2267_p11 }
 0xa12   : > { %2275 = shalt.err (!%p2272_p0)
}
 0xa13   : > { %1984 = dma.vmem_to_hbm [thread:$0]  (%p2878_p1), %s2777_s21, 128, %s2775_s13, %s1612_s16  }
 0xa14 PF: > { %s2879_s9 = sld [smem:[#allocation19_spill]]  ;;  %p2011_p2 = scmp.ge.s32.totalorder %s2354_s20, 2 }
 0xa15   : > { %s2880_s26 = sld [smem:[#allocation25_spill]] }
 0xa1a   : > { %s1639_s29 = sand.u32 1, %s2879_s9  }
 0xa1b   : > { %p2881_p4 = scmp.ne.s32.totalorder %s2880_s26, 0  ;;  %s1640_s17 = scalar_lea.sflag [#allocation8], %s1639_s29 }
 0xa1d   : > { %p2000_p6 = pnand %p2011_p2, %p2881_p4 }
 0xa1f   : > { %p2001_p5 = pneg %p2000_p6 }
 0xa21   : > { %2321 = dma.done.wait (%p2001_p5), %s1640_s17, 128  }
 0xa22   : > { %2323 = vsyncadd (%p2001_p5), %s1640_s17, 4294967168  ;;  %s30_s20 = sadd.s32 1, %s2354_s20   ;;  %s2882_s27 = sld [smem:[#allocation20_spill]] }
 0xa23   : > { %p27_p7 = scmp.ge.s32.totalorder %s30_s20, 6   ;;  %s2883_s15 = sld [smem:[#allocation26_spill]] }
 0xa24   : > { %s2884_s16 = sld [smem:[#allocation21_spill]]  ;;  %s2888_s29 = smov %s2330_s30 }
 0xa25   : > { %s2885_s17 = sld [smem:[#allocation22_spill]]  ;;  %29 = sbr.rel (!%p27_p7) target bundleno = 13 (0xd), region = 145 }
 0xa26   : > { %s2886_s18 = sld [smem:[#allocation23_spill]] }
 0xa27   : > { %s2887_s19 = sld [smem:[#allocation24_spill]] }
 0xa28   : > { %s2889_s30 = smov %s2882_s27 }
 0xa2a   :  { %1645 = vsyncpa [#allocation7], 1 }
 0xa2b   :  { %1647 = vsyncpa [#allocation7 + $0x1], 1 }
 0xa2c   :  { %1648 = vsyncpa [#allocation10], 1 }
 0xa2d   :  { %1649 = vsyncpa [#allocation13], 1 }
 0xa2e   :  { %1650 = vsyncpa [#allocation8], 1 }
 0xa2f   :  { %1652 = vsyncpa [#allocation8 + $0x1], 1 }

</bundles_post_ra>
